<compile_context>
chip_gen: v7x
topology: tpu7x:2x2x1
jax: 0.10.0
libtpu: 0.0.40
codegen_flags: <defaults>
</compile_context>

<pallas_src>
import jax
import jax.numpy as jnp
import numpy as np
from jax.experimental import pallas as pl
from jax.experimental.pallas import tpu as pltpu


# ----------------------------- configuration -----------------------------
SIDE = 8                 # "image" side (module hardcodes 28; small demo here)
C = SIDE * SIDE          # c_in  (module: 784)
CP = 128                 # lane-padded c_in (next multiple of 128)
H = 128                  # n_hidden (module: 1024)
N_FLOWS = 4              # as in Flow.__init__
L = 2 * N_FLOWS          # number of Coupling layers
B = 8                    # batch


def get_mask(side: int) -> np.ndarray:
    """Checkerboard mask, identical construction to the PyTorch get_mask()."""
    mask = np.zeros((side, side), dtype=np.float32)
    for i in range(side):
        for j in range(side):
            if (i + j) % 2 == 0:
                mask[i, j] = 1.0
    return mask.reshape(1, side * side)


# ------------------------------- the kernel -------------------------------
def flow_kernel(
    masks_ref,      # (2, 1, CP)  f32   distinct checkerboard masks (pad lanes 0)
    inv_masks_ref,  # (2, 1, CP)  f32   1-mask in the real lanes, 0 in pad lanes
    w1_ref, b1_ref,  # (L, CP, H) bf16 (mask folded into rows), (L, 1, H) f32
    w2_ref, b2_ref,  # (L, H, H)  bf16, (L, 1, H)  f32
    w3_ref, b3_ref,  # (L, H, 2*CP) bf16 fused [Wh|Wt] head, (L, 1, 2*CP) f32
    z_in_ref, ldj_in_ref,    # (B, CP) f32, (B, 1) f32
    z_out_ref, ldj_out_ref,  # (B, CP) f32, (B, 1) f32
):
    z = z_in_ref[...]            # (B, CP)  carried in registers
    ldj = ldj_in_ref[...]        # (B, 1)   carried in registers

    # Hoist the two distinct masks out of the unrolled loop.
    m_all = [masks_ref[0], masks_ref[1]]        # each (1, CP)
    im_all = [inv_masks_ref[0], inv_masks_ref[1]]

    # Statically unrolled loop over all coupling layers (L is small & fixed).
    for l in range(L):
        m = m_all[l % 2]
        im = im_all[l % 2]

        # Coupling MLP: nn(mask * z).  The mask is folded into W1's rows, so
        # we feed z directly.  bf16 MXU operands, f32 accumulation.
        zb = z.astype(jnp.bfloat16)
        h1 = jnp.maximum(
            jnp.dot(zb, w1_ref[l], preferred_element_type=jnp.float32)
            + b1_ref[l], 0.0)
        h2 = jnp.maximum(
            jnp.dot(h1.astype(jnp.bfloat16), w2_ref[l],
                    preferred_element_type=jnp.float32)
            + b2_ref[l], 0.0)
        # Fused final Linear(H, 2*CP): one lane-dense (B, 256) matmul, then a
        # split exactly on the vreg boundary at lane CP=128
        # (== torch Linear(H, 2*c_in) followed by .split(c_in, dim=1)).
        ht = (jnp.dot(h2.astype(jnp.bfloat16), w3_ref[l],
                      preferred_element_type=jnp.float32) + b3_ref[l])
        log_scale = jnp.tanh(ht[:, :CP])
        t = ht[:, CP:]

        # Forward (reverse=False) coupling update, refactored:
        #   m*z + im*(z*exp(ls) + t)  ==  z*(m + im*exp(ls)) + im*t
        e = jnp.exp(log_scale)
        z = z * (m + im * e) + im * t
        ldj = ldj + jnp.sum(im * log_scale, axis=1, keepdims=True)

    # Single write-out (only narrow store in the whole kernel is ldj).
    z_out_ref[...] = z
    ldj_out_ref[...] = ldj


# ------------------------------- the wrapper -------------------------------
@jax.jit
def flow_forward(kparams, z, logdet):
    """Forward (reverse=False) pass of Flow. z: (B, C), logdet: (B,)."""
    masks2, inv_masks2, w1, b1, w2, b2, w3, b3 = kparams

    # Lane-pad z to CP (pad lanes are zero; pad-mask and pad-inv-mask are both
    # zero so those lanes never contribute to z or logdet).
    z_pad = jnp.pad(z, ((0, 0), (0, CP - C)))
    ldj2d = logdet.reshape(B, 1)

    whole = lambda *shp: pl.BlockSpec(shp, lambda i: (0,) * len(shp))

    z_out, ldj_out = pl.pallas_call(
        flow_kernel,
        out_shape=(
            jax.ShapeDtypeStruct((B, CP), jnp.float32),
            jax.ShapeDtypeStruct((B, 1), jnp.float32),
        ),
        grid_spec=pltpu.PrefetchScalarGridSpec(
            num_scalar_prefetch=0,
            grid=(1,),                       # single step: all layers in-kernel
            in_specs=[
                whole(2, 1, CP),             # masks (2 distinct, padded)
                whole(2, 1, CP),             # inv_masks (padded with zeros)
                whole(L, CP, H),             # W1 (bf16, mask folded, padded rows)
                whole(L, 1, H),              # b1
                whole(L, H, H),              # W2 (bf16)
                whole(L, 1, H),              # b2
                whole(L, H, 2 * CP),         # W3 fused [Wh | 0 | Wt | 0] (bf16)
                whole(L, 1, 2 * CP),         # b3 fused [bh | 0 | bt | 0]
                whole(B, CP),                # z in (padded)
                whole(B, 1),                 # logdet in
            ],
            out_specs=[whole(B, CP), whole(B, 1)],
        ),
        # z / logdet are freshly created inside this jit, so aliasing them to
        # the outputs is safe and avoids separate HBM output buffers.
        input_output_aliases={8: 0, 9: 1},
        compiler_params=pltpu.CompilerParams(
            dimension_semantics=("arbitrary",),
        ),
    )(masks2, inv_masks2, w1, b1, w2, b2, w3, b3, z_pad, ldj2d)

    return z_out[:, :C], ldj_out.reshape(B)


# --------------------------- deterministic params ---------------------------
def init_params(key):
    """Raw (unpadded, f32) parameters matching the PyTorch module layout."""
    base = get_mask(SIDE)                            # (1, C)
    masks = np.concatenate(
        [base if (l % 2 == 0) else (1.0 - base) for l in range(L)], axis=0
    ).reshape(L, 1, C).astype(np.float32)            # alternating mask / 1-mask

    def uniform(k, shape, fan_in):
        bound = 1.0 / np.sqrt(fan_in)
        return jax.random.uniform(k, shape, jnp.float32, -bound, bound)

    ks = jax.random.split(key, L * 8).reshape(L, 8, 2)
    w1 = jnp.stack([uniform(ks[l, 0], (C, H), C) for l in range(L)])
    b1 = jnp.stack([uniform(ks[l, 1], (1, H), C) for l in range(L)])
    w2 = jnp.stack([uniform(ks[l, 2], (H, H), H) for l in range(L)])
    b2 = jnp.stack([uniform(ks[l, 3], (1, H), H) for l in range(L)])
    # NOTE: the PyTorch __init__ zero-initializes the final Linear (identity
    # flow); small deterministic values are used instead so the kernel math is
    # exercised.  Fused head: [Wh | Wt] -> (H, 2C), [bh | bt] -> (1, 2C).
    wh = jnp.stack([0.01 * jax.random.normal(ks[l, 4], (H, C)) for l in range(L)])
    bh = jnp.stack([0.01 * jax.random.normal(ks[l, 5], (1, C)) for l in range(L)])
    wt = jnp.stack([0.01 * jax.random.normal(ks[l, 6], (H, C)) for l in range(L)])
    bt = jnp.stack([0.01 * jax.random.normal(ks[l, 7], (1, C)) for l in range(L)])
    w3 = jnp.concatenate([wh, wt], axis=-1)          # (L, H, 2C)
    b3 = jnp.concatenate([bh, bt], axis=-1)          # (L, 1, 2C)
    return (jnp.asarray(masks), w1, b1, w2, b2, w3, b3)


def prepare_kernel_params(raw):
    """Pad to CP lanes, fold the mask into W1, cast MXU operands to bf16."""
    masks, w1, b1, w2, b2, w3, b3 = raw
    pad_c = ((0, 0), (0, 0), (0, CP - C))

    # Two distinct masks, lane-padded; pad lanes are 0 in BOTH mask and
    # inv-mask so padded lanes contribute nothing to z or logdet.
    m2 = masks[:2]                                        # (2, 1, C)
    masks2 = jnp.pad(m2, pad_c)
    inv_masks2 = jnp.pad(1.0 - m2, pad_c)

    # Fold per-layer mask into W1 rows (mask entries are exactly 0/1 so this
    # is numerically identical to computing mask*z first), cast bf16, pad rows.
    mask_col = jnp.transpose(masks, (0, 2, 1))            # (L, C, 1)
    w1f = (w1 * mask_col).astype(jnp.bfloat16)            # (L, C, H)
    w1p = jnp.pad(w1f, ((0, 0), (0, CP - C), (0, 0)))     # (L, CP, H)

    w2b = w2.astype(jnp.bfloat16)

    # Pad the fused head so the h/t split sits on lane CP: [Wh | 0 | Wt | 0].
    wh, wt = w3[..., :C], w3[..., C:]
    w3p = jnp.concatenate(
        [jnp.pad(wh, pad_c), jnp.pad(wt, pad_c)], axis=-1
    ).astype(jnp.bfloat16)                                # (L, H, 2*CP)
    bh, bt = b3[..., :C], b3[..., C:]
    b3p = jnp.concatenate(
        [jnp.pad(bh, pad_c), jnp.pad(bt, pad_c)], axis=-1)  # (L, 1, 2*CP) f32

    return (masks2, inv_masks2, w1p, b1, w2b, b2, w3p, b3p)


# --------------------------- pure-JAX reference ---------------------------
def flow_reference(raw, z, logdet):
    """Reference with the module's semantics; uses the same bf16 MXU operands
    (f32 accumulation, f32 elementwise) as the kernel so tolerances stay tight."""
    masks, w1, b1, w2, b2, w3, b3 = raw
    for l in range(L):
        m = masks[l]                                     # (1, C)
        x = (m * z).astype(jnp.bfloat16)
        h1 = jnp.maximum(
            jnp.dot(x, w1[l].astype(jnp.bfloat16),
                    preferred_element_type=jnp.float32) + b1[l], 0.0)
        h2 = jnp.maximum(
            jnp.dot(h1.astype(jnp.bfloat16), w2[l].astype(jnp.bfloat16),
                    preferred_element_type=jnp.float32) + b2[l], 0.0)
        ht = jnp.dot(h2.astype(jnp.bfloat16), w3[l].astype(jnp.bfloat16),
                     preferred_element_type=jnp.float32) + b3[l]
        h, t = ht[:, :C], ht[:, C:]
        ls = jnp.tanh(h)
        z = m * z + (1.0 - m) * (z * jnp.exp(ls) + t)
        logdet = logdet + jnp.sum((1.0 - m) * ls, axis=1)
    return z, logdet


# ----------------------------------- main -----------------------------------
if __name__ == "__main__":
    key = jax.random.PRNGKey(0)
    kp, kz = jax.random.split(key)
    raw_params = init_params(kp)
    kparams = prepare_kernel_params(raw_params)

    z = jax.random.normal(kz, (B, C), jnp.float32)
    logdet = jnp.zeros((B,), jnp.float32)

    z_out, ldj_out = flow_forward(kparams, z, logdet)
    jax.block_until_ready((z_out, ldj_out))

    z_ref, ldj_ref = flow_reference(raw_params, z, logdet)
    np.testing.assert_allclose(np.asarray(z_out), np.asarray(z_ref),
                               rtol=5e-3, atol=5e-3)
    np.testing.assert_allclose(np.asarray(ldj_out), np.asarray(ldj_ref),
                               rtol=5e-3, atol=5e-3)

    # TODO(synk): reverse=True path of Coupling/Flow not implemented (spec's
    # forward pass with reverse=False only).
    print("KERNEL_OK")
</pallas_src>

<mosaic_0001>
module attributes {stable_mosaic.version = 11 : i64} {
  func.func @flow_kernel(%arg0: i32, %arg1: memref<2x1x128xf32, #tpu.memory_space<vmem>>, %arg2: memref<2x1x128xf32, #tpu.memory_space<vmem>>, %arg3: memref<8x128x128xbf16, #tpu.memory_space<vmem>>, %arg4: memref<8x1x128xf32, #tpu.memory_space<vmem>>, %arg5: memref<8x128x128xbf16, #tpu.memory_space<vmem>>, %arg6: memref<8x1x128xf32, #tpu.memory_space<vmem>>, %arg7: memref<8x128x256xbf16, #tpu.memory_space<vmem>>, %arg8: memref<8x1x256xf32, #tpu.memory_space<vmem>>, %arg9: memref<8x128xf32, #tpu.memory_space<vmem>>, %arg10: memref<8x1xf32, #tpu.memory_space<vmem>>, %arg11: memref<8x128xf32, #tpu.memory_space<vmem>>, %arg12: memref<8x1xf32, #tpu.memory_space<vmem>>) attributes {dimension_semantics = [#tpu.dimension_semantics<arbitrary>], iteration_bounds = array<i64: 1>, scalar_prefetch = 0 : i64, scratch_operands = 0 : i64, tpu.core_type = #tpu.core_type<tc>, window_params = [{pipeline_mode = #tpu.pipeline_mode<synchronous>, transform_indices = @transform_0, window_bounds = array<i64: 2, 1, 128>}, {pipeline_mode = #tpu.pipeline_mode<synchronous>, transform_indices = @transform_1, window_bounds = array<i64: 2, 1, 128>}, {pipeline_mode = #tpu.pipeline_mode<synchronous>, transform_indices = @transform_2, window_bounds = array<i64: 8, 128, 128>}, {pipeline_mode = #tpu.pipeline_mode<synchronous>, transform_indices = @transform_3, window_bounds = array<i64: 8, 1, 128>}, {pipeline_mode = #tpu.pipeline_mode<synchronous>, transform_indices = @transform_4, window_bounds = array<i64: 8, 128, 128>}, {pipeline_mode = #tpu.pipeline_mode<synchronous>, transform_indices = @transform_5, window_bounds = array<i64: 8, 1, 128>}, {pipeline_mode = #tpu.pipeline_mode<synchronous>, transform_indices = @transform_6, window_bounds = array<i64: 8, 128, 256>}, {pipeline_mode = #tpu.pipeline_mode<synchronous>, transform_indices = @transform_7, window_bounds = array<i64: 8, 1, 256>}, {pipeline_mode = #tpu.pipeline_mode<synchronous>, transform_indices = @transform_8, window_bounds = array<i64: 8, 128>}, {pipeline_mode = #tpu.pipeline_mode<synchronous>, transform_indices = @transform_9, window_bounds = array<i64: 8, 1>}, {pipeline_mode = #tpu.pipeline_mode<synchronous>, transform_indices = @transform_10, window_bounds = array<i64: 8, 128>}, {pipeline_mode = #tpu.pipeline_mode<synchronous>, transform_indices = @transform_11, window_bounds = array<i64: 8, 1>}]} {
    %c0 = arith.constant 0 : index
    %c0_0 = arith.constant 0 : index
    %0 = vector.load %arg9[%c0, %c0_0] : memref<8x128xf32, #tpu.memory_space<vmem>>, vector<8x128xf32>
    %c0_1 = arith.constant 0 : index
    %c0_2 = arith.constant 0 : index
    %1 = vector.load %arg10[%c0_1, %c0_2] : memref<8x1xf32, #tpu.memory_space<vmem>>, vector<8x1xf32>
    %c0_3 = arith.constant 0 : index
    %c0_4 = arith.constant 0 : index
    %c0_5 = arith.constant 0 : index
    %2 = vector.load %arg1[%c0_3, %c0_4, %c0_5] : memref<2x1x128xf32, #tpu.memory_space<vmem>>, vector<1x1x128xf32>
    %3 = vector.shape_cast %2 : vector<1x1x128xf32> to vector<1x128xf32>
    %c1 = arith.constant 1 : index
    %c0_6 = arith.constant 0 : index
    %c0_7 = arith.constant 0 : index
    %4 = vector.load %arg1[%c1, %c0_6, %c0_7] : memref<2x1x128xf32, #tpu.memory_space<vmem>>, vector<1x1x128xf32>
    %5 = vector.shape_cast %4 : vector<1x1x128xf32> to vector<1x128xf32>
    %c0_8 = arith.constant 0 : index
    %c0_9 = arith.constant 0 : index
    %c0_10 = arith.constant 0 : index
    %6 = vector.load %arg2[%c0_8, %c0_9, %c0_10] : memref<2x1x128xf32, #tpu.memory_space<vmem>>, vector<1x1x128xf32>
    %7 = vector.shape_cast %6 : vector<1x1x128xf32> to vector<1x128xf32>
    %c1_11 = arith.constant 1 : index
    %c0_12 = arith.constant 0 : index
    %c0_13 = arith.constant 0 : index
    %8 = vector.load %arg2[%c1_11, %c0_12, %c0_13] : memref<2x1x128xf32, #tpu.memory_space<vmem>>, vector<1x1x128xf32>
    %9 = vector.shape_cast %8 : vector<1x1x128xf32> to vector<1x128xf32>
    %10 = arith.truncf %0 : vector<8x128xf32> to vector<8x128xbf16>
    %c0_14 = arith.constant 0 : index
    %c0_15 = arith.constant 0 : index
    %c0_16 = arith.constant 0 : index
    %11 = vector.load %arg3[%c0_14, %c0_15, %c0_16] : memref<8x128x128xbf16, #tpu.memory_space<vmem>>, vector<1x128x128xbf16>
    %12 = vector.shape_cast %11 : vector<1x128x128xbf16> to vector<128x128xbf16>
    %cst = arith.constant dense<0.000000e+00> : vector<8x128xf32>
    %13 = tpu.matmul %10, %12, %cst {dimension_numbers = #tpu.dot_dimension_numbers<[1], [0], [0], [1], [0, 0, 1, 1], [], []>} : vector<8x128xbf16>, vector<128x128xbf16>, vector<8x128xf32> -> vector<8x128xf32>
    %c0_17 = arith.constant 0 : index
    %c0_18 = arith.constant 0 : index
    %c0_19 = arith.constant 0 : index
    %14 = vector.load %arg4[%c0_17, %c0_18, %c0_19] : memref<8x1x128xf32, #tpu.memory_space<vmem>>, vector<1x1x128xf32>
    %15 = vector.shape_cast %14 : vector<1x1x128xf32> to vector<1x128xf32>
    %16 = vector.broadcast %15 : vector<1x128xf32> to vector<8x128xf32>
    %17 = arith.addf %13, %16 : vector<8x128xf32>
    %cst_20 = arith.constant 0.000000e+00 : f32
    %18 = vector.broadcast %cst_20 : f32 to vector<8x128xf32>
    %19 = arith.maximumf %17, %18 : vector<8x128xf32>
    %20 = arith.truncf %19 : vector<8x128xf32> to vector<8x128xbf16>
    %c0_21 = arith.constant 0 : index
    %c0_22 = arith.constant 0 : index
    %c0_23 = arith.constant 0 : index
    %21 = vector.load %arg5[%c0_21, %c0_22, %c0_23] : memref<8x128x128xbf16, #tpu.memory_space<vmem>>, vector<1x128x128xbf16>
    %22 = vector.shape_cast %21 : vector<1x128x128xbf16> to vector<128x128xbf16>
    %cst_24 = arith.constant dense<0.000000e+00> : vector<8x128xf32>
    %23 = tpu.matmul %20, %22, %cst_24 {dimension_numbers = #tpu.dot_dimension_numbers<[1], [0], [0], [1], [0, 0, 1, 1], [], []>} : vector<8x128xbf16>, vector<128x128xbf16>, vector<8x128xf32> -> vector<8x128xf32>
    %c0_25 = arith.constant 0 : index
    %c0_26 = arith.constant 0 : index
    %c0_27 = arith.constant 0 : index
    %24 = vector.load %arg6[%c0_25, %c0_26, %c0_27] : memref<8x1x128xf32, #tpu.memory_space<vmem>>, vector<1x1x128xf32>
    %25 = vector.shape_cast %24 : vector<1x1x128xf32> to vector<1x128xf32>
    %26 = vector.broadcast %25 : vector<1x128xf32> to vector<8x128xf32>
    %27 = arith.addf %23, %26 : vector<8x128xf32>
    %cst_28 = arith.constant 0.000000e+00 : f32
    %28 = vector.broadcast %cst_28 : f32 to vector<8x128xf32>
    %29 = arith.maximumf %27, %28 : vector<8x128xf32>
    %30 = arith.truncf %29 : vector<8x128xf32> to vector<8x128xbf16>
    %c0_29 = arith.constant 0 : index
    %c0_30 = arith.constant 0 : index
    %c0_31 = arith.constant 0 : index
    %31 = vector.load %arg7[%c0_29, %c0_30, %c0_31] : memref<8x128x256xbf16, #tpu.memory_space<vmem>>, vector<1x128x256xbf16>
    %32 = vector.shape_cast %31 : vector<1x128x256xbf16> to vector<128x256xbf16>
    %cst_32 = arith.constant dense<0.000000e+00> : vector<8x256xf32>
    %33 = tpu.matmul %30, %32, %cst_32 {dimension_numbers = #tpu.dot_dimension_numbers<[1], [0], [0], [1], [0, 0, 1, 1], [], []>} : vector<8x128xbf16>, vector<128x256xbf16>, vector<8x256xf32> -> vector<8x256xf32>
    %c0_33 = arith.constant 0 : index
    %c0_34 = arith.constant 0 : index
    %c0_35 = arith.constant 0 : index
    %34 = vector.load %arg8[%c0_33, %c0_34, %c0_35] : memref<8x1x256xf32, #tpu.memory_space<vmem>>, vector<1x1x256xf32>
    %35 = vector.shape_cast %34 : vector<1x1x256xf32> to vector<1x256xf32>
    %36 = vector.broadcast %35 : vector<1x256xf32> to vector<8x256xf32>
    %37 = arith.addf %33, %36 : vector<8x256xf32>
    %38 = vector.extract_strided_slice %37 {offsets = [0, 0], sizes = [8, 128], strides = [1, 1]} : vector<8x256xf32> to vector<8x128xf32>
    %39 = math.tanh %38 : vector<8x128xf32>
    %40 = vector.extract_strided_slice %37 {offsets = [0, 128], sizes = [8, 128], strides = [1, 1]} : vector<8x256xf32> to vector<8x128xf32>
    %41 = math.exp %39 : vector<8x128xf32>
    %42 = vector.broadcast %7 : vector<1x128xf32> to vector<8x128xf32>
    %43 = arith.mulf %42, %41 : vector<8x128xf32>
    %44 = vector.broadcast %3 : vector<1x128xf32> to vector<8x128xf32>
    %45 = arith.addf %44, %43 : vector<8x128xf32>
    %46 = arith.mulf %0, %45 : vector<8x128xf32>
    %47 = vector.broadcast %7 : vector<1x128xf32> to vector<8x128xf32>
    %48 = arith.mulf %47, %40 : vector<8x128xf32>
    %49 = arith.addf %46, %48 : vector<8x128xf32>
    %50 = vector.broadcast %7 : vector<1x128xf32> to vector<8x128xf32>
    %51 = arith.mulf %50, %39 : vector<8x128xf32>
    %cst_36 = arith.constant dense<0.000000e+00> : vector<8xf32>
    %52 = vector.multi_reduction <add>, %51, %cst_36 [1] : vector<8x128xf32> to vector<8xf32>
    %53 = vector.shape_cast %52 : vector<8xf32> to vector<8x1xf32>
    %54 = arith.addf %1, %53 : vector<8x1xf32>
    %55 = arith.truncf %49 : vector<8x128xf32> to vector<8x128xbf16>
    %c1_37 = arith.constant 1 : index
    %c0_38 = arith.constant 0 : index
    %c0_39 = arith.constant 0 : index
    %56 = vector.load %arg3[%c1_37, %c0_38, %c0_39] : memref<8x128x128xbf16, #tpu.memory_space<vmem>>, vector<1x128x128xbf16>
    %57 = vector.shape_cast %56 : vector<1x128x128xbf16> to vector<128x128xbf16>
    %cst_40 = arith.constant dense<0.000000e+00> : vector<8x128xf32>
    %58 = tpu.matmul %55, %57, %cst_40 {dimension_numbers = #tpu.dot_dimension_numbers<[1], [0], [0], [1], [0, 0, 1, 1], [], []>} : vector<8x128xbf16>, vector<128x128xbf16>, vector<8x128xf32> -> vector<8x128xf32>
    %c1_41 = arith.constant 1 : index
    %c0_42 = arith.constant 0 : index
    %c0_43 = arith.constant 0 : index
    %59 = vector.load %arg4[%c1_41, %c0_42, %c0_43] : memref<8x1x128xf32, #tpu.memory_space<vmem>>, vector<1x1x128xf32>
    %60 = vector.shape_cast %59 : vector<1x1x128xf32> to vector<1x128xf32>
    %61 = vector.broadcast %60 : vector<1x128xf32> to vector<8x128xf32>
    %62 = arith.addf %58, %61 : vector<8x128xf32>
    %cst_44 = arith.constant 0.000000e+00 : f32
    %63 = vector.broadcast %cst_44 : f32 to vector<8x128xf32>
    %64 = arith.maximumf %62, %63 : vector<8x128xf32>
    %65 = arith.truncf %64 : vector<8x128xf32> to vector<8x128xbf16>
    %c1_45 = arith.constant 1 : index
    %c0_46 = arith.constant 0 : index
    %c0_47 = arith.constant 0 : index
    %66 = vector.load %arg5[%c1_45, %c0_46, %c0_47] : memref<8x128x128xbf16, #tpu.memory_space<vmem>>, vector<1x128x128xbf16>
    %67 = vector.shape_cast %66 : vector<1x128x128xbf16> to vector<128x128xbf16>
    %cst_48 = arith.constant dense<0.000000e+00> : vector<8x128xf32>
    %68 = tpu.matmul %65, %67, %cst_48 {dimension_numbers = #tpu.dot_dimension_numbers<[1], [0], [0], [1], [0, 0, 1, 1], [], []>} : vector<8x128xbf16>, vector<128x128xbf16>, vector<8x128xf32> -> vector<8x128xf32>
    %c1_49 = arith.constant 1 : index
    %c0_50 = arith.constant 0 : index
    %c0_51 = arith.constant 0 : index
    %69 = vector.load %arg6[%c1_49, %c0_50, %c0_51] : memref<8x1x128xf32, #tpu.memory_space<vmem>>, vector<1x1x128xf32>
    %70 = vector.shape_cast %69 : vector<1x1x128xf32> to vector<1x128xf32>
    %71 = vector.broadcast %70 : vector<1x128xf32> to vector<8x128xf32>
    %72 = arith.addf %68, %71 : vector<8x128xf32>
    %cst_52 = arith.constant 0.000000e+00 : f32
    %73 = vector.broadcast %cst_52 : f32 to vector<8x128xf32>
    %74 = arith.maximumf %72, %73 : vector<8x128xf32>
    %75 = arith.truncf %74 : vector<8x128xf32> to vector<8x128xbf16>
    %c1_53 = arith.constant 1 : index
    %c0_54 = arith.constant 0 : index
    %c0_55 = arith.constant 0 : index
    %76 = vector.load %arg7[%c1_53, %c0_54, %c0_55] : memref<8x128x256xbf16, #tpu.memory_space<vmem>>, vector<1x128x256xbf16>
    %77 = vector.shape_cast %76 : vector<1x128x256xbf16> to vector<128x256xbf16>
    %cst_56 = arith.constant dense<0.000000e+00> : vector<8x256xf32>
    %78 = tpu.matmul %75, %77, %cst_56 {dimension_numbers = #tpu.dot_dimension_numbers<[1], [0], [0], [1], [0, 0, 1, 1], [], []>} : vector<8x128xbf16>, vector<128x256xbf16>, vector<8x256xf32> -> vector<8x256xf32>
    %c1_57 = arith.constant 1 : index
    %c0_58 = arith.constant 0 : index
    %c0_59 = arith.constant 0 : index
    %79 = vector.load %arg8[%c1_57, %c0_58, %c0_59] : memref<8x1x256xf32, #tpu.memory_space<vmem>>, vector<1x1x256xf32>
    %80 = vector.shape_cast %79 : vector<1x1x256xf32> to vector<1x256xf32>
    %81 = vector.broadcast %80 : vector<1x256xf32> to vector<8x256xf32>
    %82 = arith.addf %78, %81 : vector<8x256xf32>
    %83 = vector.extract_strided_slice %82 {offsets = [0, 0], sizes = [8, 128], strides = [1, 1]} : vector<8x256xf32> to vector<8x128xf32>
    %84 = math.tanh %83 : vector<8x128xf32>
    %85 = vector.extract_strided_slice %82 {offsets = [0, 128], sizes = [8, 128], strides = [1, 1]} : vector<8x256xf32> to vector<8x128xf32>
    %86 = math.exp %84 : vector<8x128xf32>
    %87 = vector.broadcast %9 : vector<1x128xf32> to vector<8x128xf32>
    %88 = arith.mulf %87, %86 : vector<8x128xf32>
    %89 = vector.broadcast %5 : vector<1x128xf32> to vector<8x128xf32>
    %90 = arith.addf %89, %88 : vector<8x128xf32>
    %91 = arith.mulf %49, %90 : vector<8x128xf32>
    %92 = vector.broadcast %9 : vector<1x128xf32> to vector<8x128xf32>
    %93 = arith.mulf %92, %85 : vector<8x128xf32>
    %94 = arith.addf %91, %93 : vector<8x128xf32>
    %95 = vector.broadcast %9 : vector<1x128xf32> to vector<8x128xf32>
    %96 = arith.mulf %95, %84 : vector<8x128xf32>
    %cst_60 = arith.constant dense<0.000000e+00> : vector<8xf32>
    %97 = vector.multi_reduction <add>, %96, %cst_60 [1] : vector<8x128xf32> to vector<8xf32>
    %98 = vector.shape_cast %97 : vector<8xf32> to vector<8x1xf32>
    %99 = arith.addf %54, %98 : vector<8x1xf32>
    %100 = arith.truncf %94 : vector<8x128xf32> to vector<8x128xbf16>
    %c2 = arith.constant 2 : index
    %c0_61 = arith.constant 0 : index
    %c0_62 = arith.constant 0 : index
    %101 = vector.load %arg3[%c2, %c0_61, %c0_62] : memref<8x128x128xbf16, #tpu.memory_space<vmem>>, vector<1x128x128xbf16>
    %102 = vector.shape_cast %101 : vector<1x128x128xbf16> to vector<128x128xbf16>
    %cst_63 = arith.constant dense<0.000000e+00> : vector<8x128xf32>
    %103 = tpu.matmul %100, %102, %cst_63 {dimension_numbers = #tpu.dot_dimension_numbers<[1], [0], [0], [1], [0, 0, 1, 1], [], []>} : vector<8x128xbf16>, vector<128x128xbf16>, vector<8x128xf32> -> vector<8x128xf32>
    %c2_64 = arith.constant 2 : index
    %c0_65 = arith.constant 0 : index
    %c0_66 = arith.constant 0 : index
    %104 = vector.load %arg4[%c2_64, %c0_65, %c0_66] : memref<8x1x128xf32, #tpu.memory_space<vmem>>, vector<1x1x128xf32>
    %105 = vector.shape_cast %104 : vector<1x1x128xf32> to vector<1x128xf32>
    %106 = vector.broadcast %105 : vector<1x128xf32> to vector<8x128xf32>
    %107 = arith.addf %103, %106 : vector<8x128xf32>
    %cst_67 = arith.constant 0.000000e+00 : f32
    %108 = vector.broadcast %cst_67 : f32 to vector<8x128xf32>
    %109 = arith.maximumf %107, %108 : vector<8x128xf32>
    %110 = arith.truncf %109 : vector<8x128xf32> to vector<8x128xbf16>
    %c2_68 = arith.constant 2 : index
    %c0_69 = arith.constant 0 : index
    %c0_70 = arith.constant 0 : index
    %111 = vector.load %arg5[%c2_68, %c0_69, %c0_70] : memref<8x128x128xbf16, #tpu.memory_space<vmem>>, vector<1x128x128xbf16>
    %112 = vector.shape_cast %111 : vector<1x128x128xbf16> to vector<128x128xbf16>
    %cst_71 = arith.constant dense<0.000000e+00> : vector<8x128xf32>
    %113 = tpu.matmul %110, %112, %cst_71 {dimension_numbers = #tpu.dot_dimension_numbers<[1], [0], [0], [1], [0, 0, 1, 1], [], []>} : vector<8x128xbf16>, vector<128x128xbf16>, vector<8x128xf32> -> vector<8x128xf32>
    %c2_72 = arith.constant 2 : index
    %c0_73 = arith.constant 0 : index
    %c0_74 = arith.constant 0 : index
    %114 = vector.load %arg6[%c2_72, %c0_73, %c0_74] : memref<8x1x128xf32, #tpu.memory_space<vmem>>, vector<1x1x128xf32>
    %115 = vector.shape_cast %114 : vector<1x1x128xf32> to vector<1x128xf32>
    %116 = vector.broadcast %115 : vector<1x128xf32> to vector<8x128xf32>
    %117 = arith.addf %113, %116 : vector<8x128xf32>
    %cst_75 = arith.constant 0.000000e+00 : f32
    %118 = vector.broadcast %cst_75 : f32 to vector<8x128xf32>
    %119 = arith.maximumf %117, %118 : vector<8x128xf32>
    %120 = arith.truncf %119 : vector<8x128xf32> to vector<8x128xbf16>
    %c2_76 = arith.constant 2 : index
    %c0_77 = arith.constant 0 : index
    %c0_78 = arith.constant 0 : index
    %121 = vector.load %arg7[%c2_76, %c0_77, %c0_78] : memref<8x128x256xbf16, #tpu.memory_space<vmem>>, vector<1x128x256xbf16>
    %122 = vector.shape_cast %121 : vector<1x128x256xbf16> to vector<128x256xbf16>
    %cst_79 = arith.constant dense<0.000000e+00> : vector<8x256xf32>
    %123 = tpu.matmul %120, %122, %cst_79 {dimension_numbers = #tpu.dot_dimension_numbers<[1], [0], [0], [1], [0, 0, 1, 1], [], []>} : vector<8x128xbf16>, vector<128x256xbf16>, vector<8x256xf32> -> vector<8x256xf32>
    %c2_80 = arith.constant 2 : index
    %c0_81 = arith.constant 0 : index
    %c0_82 = arith.constant 0 : index
    %124 = vector.load %arg8[%c2_80, %c0_81, %c0_82] : memref<8x1x256xf32, #tpu.memory_space<vmem>>, vector<1x1x256xf32>
    %125 = vector.shape_cast %124 : vector<1x1x256xf32> to vector<1x256xf32>
    %126 = vector.broadcast %125 : vector<1x256xf32> to vector<8x256xf32>
    %127 = arith.addf %123, %126 : vector<8x256xf32>
    %128 = vector.extract_strided_slice %127 {offsets = [0, 0], sizes = [8, 128], strides = [1, 1]} : vector<8x256xf32> to vector<8x128xf32>
    %129 = math.tanh %128 : vector<8x128xf32>
    %130 = vector.extract_strided_slice %127 {offsets = [0, 128], sizes = [8, 128], strides = [1, 1]} : vector<8x256xf32> to vector<8x128xf32>
    %131 = math.exp %129 : vector<8x128xf32>
    %132 = vector.broadcast %7 : vector<1x128xf32> to vector<8x128xf32>
    %133 = arith.mulf %132, %131 : vector<8x128xf32>
    %134 = vector.broadcast %3 : vector<1x128xf32> to vector<8x128xf32>
    %135 = arith.addf %134, %133 : vector<8x128xf32>
    %136 = arith.mulf %94, %135 : vector<8x128xf32>
    %137 = vector.broadcast %7 : vector<1x128xf32> to vector<8x128xf32>
    %138 = arith.mulf %137, %130 : vector<8x128xf32>
    %139 = arith.addf %136, %138 : vector<8x128xf32>
    %140 = vector.broadcast %7 : vector<1x128xf32> to vector<8x128xf32>
    %141 = arith.mulf %140, %129 : vector<8x128xf32>
    %cst_83 = arith.constant dense<0.000000e+00> : vector<8xf32>
    %142 = vector.multi_reduction <add>, %141, %cst_83 [1] : vector<8x128xf32> to vector<8xf32>
    %143 = vector.shape_cast %142 : vector<8xf32> to vector<8x1xf32>
    %144 = arith.addf %99, %143 : vector<8x1xf32>
    %145 = arith.truncf %139 : vector<8x128xf32> to vector<8x128xbf16>
    %c3 = arith.constant 3 : index
    %c0_84 = arith.constant 0 : index
    %c0_85 = arith.constant 0 : index
    %146 = vector.load %arg3[%c3, %c0_84, %c0_85] : memref<8x128x128xbf16, #tpu.memory_space<vmem>>, vector<1x128x128xbf16>
    %147 = vector.shape_cast %146 : vector<1x128x128xbf16> to vector<128x128xbf16>
    %cst_86 = arith.constant dense<0.000000e+00> : vector<8x128xf32>
    %148 = tpu.matmul %145, %147, %cst_86 {dimension_numbers = #tpu.dot_dimension_numbers<[1], [0], [0], [1], [0, 0, 1, 1], [], []>} : vector<8x128xbf16>, vector<128x128xbf16>, vector<8x128xf32> -> vector<8x128xf32>
    %c3_87 = arith.constant 3 : index
    %c0_88 = arith.constant 0 : index
    %c0_89 = arith.constant 0 : index
    %149 = vector.load %arg4[%c3_87, %c0_88, %c0_89] : memref<8x1x128xf32, #tpu.memory_space<vmem>>, vector<1x1x128xf32>
    %150 = vector.shape_cast %149 : vector<1x1x128xf32> to vector<1x128xf32>
    %151 = vector.broadcast %150 : vector<1x128xf32> to vector<8x128xf32>
    %152 = arith.addf %148, %151 : vector<8x128xf32>
    %cst_90 = arith.constant 0.000000e+00 : f32
    %153 = vector.broadcast %cst_90 : f32 to vector<8x128xf32>
    %154 = arith.maximumf %152, %153 : vector<8x128xf32>
    %155 = arith.truncf %154 : vector<8x128xf32> to vector<8x128xbf16>
    %c3_91 = arith.constant 3 : index
    %c0_92 = arith.constant 0 : index
    %c0_93 = arith.constant 0 : index
    %156 = vector.load %arg5[%c3_91, %c0_92, %c0_93] : memref<8x128x128xbf16, #tpu.memory_space<vmem>>, vector<1x128x128xbf16>
    %157 = vector.shape_cast %156 : vector<1x128x128xbf16> to vector<128x128xbf16>
    %cst_94 = arith.constant dense<0.000000e+00> : vector<8x128xf32>
    %158 = tpu.matmul %155, %157, %cst_94 {dimension_numbers = #tpu.dot_dimension_numbers<[1], [0], [0], [1], [0, 0, 1, 1], [], []>} : vector<8x128xbf16>, vector<128x128xbf16>, vector<8x128xf32> -> vector<8x128xf32>
    %c3_95 = arith.constant 3 : index
    %c0_96 = arith.constant 0 : index
    %c0_97 = arith.constant 0 : index
    %159 = vector.load %arg6[%c3_95, %c0_96, %c0_97] : memref<8x1x128xf32, #tpu.memory_space<vmem>>, vector<1x1x128xf32>
    %160 = vector.shape_cast %159 : vector<1x1x128xf32> to vector<1x128xf32>
    %161 = vector.broadcast %160 : vector<1x128xf32> to vector<8x128xf32>
    %162 = arith.addf %158, %161 : vector<8x128xf32>
    %cst_98 = arith.constant 0.000000e+00 : f32
    %163 = vector.broadcast %cst_98 : f32 to vector<8x128xf32>
    %164 = arith.maximumf %162, %163 : vector<8x128xf32>
    %165 = arith.truncf %164 : vector<8x128xf32> to vector<8x128xbf16>
    %c3_99 = arith.constant 3 : index
    %c0_100 = arith.constant 0 : index
    %c0_101 = arith.constant 0 : index
    %166 = vector.load %arg7[%c3_99, %c0_100, %c0_101] : memref<8x128x256xbf16, #tpu.memory_space<vmem>>, vector<1x128x256xbf16>
    %167 = vector.shape_cast %166 : vector<1x128x256xbf16> to vector<128x256xbf16>
    %cst_102 = arith.constant dense<0.000000e+00> : vector<8x256xf32>
    %168 = tpu.matmul %165, %167, %cst_102 {dimension_numbers = #tpu.dot_dimension_numbers<[1], [0], [0], [1], [0, 0, 1, 1], [], []>} : vector<8x128xbf16>, vector<128x256xbf16>, vector<8x256xf32> -> vector<8x256xf32>
    %c3_103 = arith.constant 3 : index
    %c0_104 = arith.constant 0 : index
    %c0_105 = arith.constant 0 : index
    %169 = vector.load %arg8[%c3_103, %c0_104, %c0_105] : memref<8x1x256xf32, #tpu.memory_space<vmem>>, vector<1x1x256xf32>
    %170 = vector.shape_cast %169 : vector<1x1x256xf32> to vector<1x256xf32>
    %171 = vector.broadcast %170 : vector<1x256xf32> to vector<8x256xf32>
    %172 = arith.addf %168, %171 : vector<8x256xf32>
    %173 = vector.extract_strided_slice %172 {offsets = [0, 0], sizes = [8, 128], strides = [1, 1]} : vector<8x256xf32> to vector<8x128xf32>
    %174 = math.tanh %173 : vector<8x128xf32>
    %175 = vector.extract_strided_slice %172 {offsets = [0, 128], sizes = [8, 128], strides = [1, 1]} : vector<8x256xf32> to vector<8x128xf32>
    %176 = math.exp %174 : vector<8x128xf32>
    %177 = vector.broadcast %9 : vector<1x128xf32> to vector<8x128xf32>
    %178 = arith.mulf %177, %176 : vector<8x128xf32>
    %179 = vector.broadcast %5 : vector<1x128xf32> to vector<8x128xf32>
    %180 = arith.addf %179, %178 : vector<8x128xf32>
    %181 = arith.mulf %139, %180 : vector<8x128xf32>
    %182 = vector.broadcast %9 : vector<1x128xf32> to vector<8x128xf32>
    %183 = arith.mulf %182, %175 : vector<8x128xf32>
    %184 = arith.addf %181, %183 : vector<8x128xf32>
    %185 = vector.broadcast %9 : vector<1x128xf32> to vector<8x128xf32>
    %186 = arith.mulf %185, %174 : vector<8x128xf32>
    %cst_106 = arith.constant dense<0.000000e+00> : vector<8xf32>
    %187 = vector.multi_reduction <add>, %186, %cst_106 [1] : vector<8x128xf32> to vector<8xf32>
    %188 = vector.shape_cast %187 : vector<8xf32> to vector<8x1xf32>
    %189 = arith.addf %144, %188 : vector<8x1xf32>
    %190 = arith.truncf %184 : vector<8x128xf32> to vector<8x128xbf16>
    %c4 = arith.constant 4 : index
    %c0_107 = arith.constant 0 : index
    %c0_108 = arith.constant 0 : index
    %191 = vector.load %arg3[%c4, %c0_107, %c0_108] : memref<8x128x128xbf16, #tpu.memory_space<vmem>>, vector<1x128x128xbf16>
    %192 = vector.shape_cast %191 : vector<1x128x128xbf16> to vector<128x128xbf16>
    %cst_109 = arith.constant dense<0.000000e+00> : vector<8x128xf32>
    %193 = tpu.matmul %190, %192, %cst_109 {dimension_numbers = #tpu.dot_dimension_numbers<[1], [0], [0], [1], [0, 0, 1, 1], [], []>} : vector<8x128xbf16>, vector<128x128xbf16>, vector<8x128xf32> -> vector<8x128xf32>
    %c4_110 = arith.constant 4 : index
    %c0_111 = arith.constant 0 : index
    %c0_112 = arith.constant 0 : index
    %194 = vector.load %arg4[%c4_110, %c0_111, %c0_112] : memref<8x1x128xf32, #tpu.memory_space<vmem>>, vector<1x1x128xf32>
    %195 = vector.shape_cast %194 : vector<1x1x128xf32> to vector<1x128xf32>
    %196 = vector.broadcast %195 : vector<1x128xf32> to vector<8x128xf32>
    %197 = arith.addf %193, %196 : vector<8x128xf32>
    %cst_113 = arith.constant 0.000000e+00 : f32
    %198 = vector.broadcast %cst_113 : f32 to vector<8x128xf32>
    %199 = arith.maximumf %197, %198 : vector<8x128xf32>
    %200 = arith.truncf %199 : vector<8x128xf32> to vector<8x128xbf16>
    %c4_114 = arith.constant 4 : index
    %c0_115 = arith.constant 0 : index
    %c0_116 = arith.constant 0 : index
    %201 = vector.load %arg5[%c4_114, %c0_115, %c0_116] : memref<8x128x128xbf16, #tpu.memory_space<vmem>>, vector<1x128x128xbf16>
    %202 = vector.shape_cast %201 : vector<1x128x128xbf16> to vector<128x128xbf16>
    %cst_117 = arith.constant dense<0.000000e+00> : vector<8x128xf32>
    %203 = tpu.matmul %200, %202, %cst_117 {dimension_numbers = #tpu.dot_dimension_numbers<[1], [0], [0], [1], [0, 0, 1, 1], [], []>} : vector<8x128xbf16>, vector<128x128xbf16>, vector<8x128xf32> -> vector<8x128xf32>
    %c4_118 = arith.constant 4 : index
    %c0_119 = arith.constant 0 : index
    %c0_120 = arith.constant 0 : index
    %204 = vector.load %arg6[%c4_118, %c0_119, %c0_120] : memref<8x1x128xf32, #tpu.memory_space<vmem>>, vector<1x1x128xf32>
    %205 = vector.shape_cast %204 : vector<1x1x128xf32> to vector<1x128xf32>
    %206 = vector.broadcast %205 : vector<1x128xf32> to vector<8x128xf32>
    %207 = arith.addf %203, %206 : vector<8x128xf32>
    %cst_121 = arith.constant 0.000000e+00 : f32
    %208 = vector.broadcast %cst_121 : f32 to vector<8x128xf32>
    %209 = arith.maximumf %207, %208 : vector<8x128xf32>
    %210 = arith.truncf %209 : vector<8x128xf32> to vector<8x128xbf16>
    %c4_122 = arith.constant 4 : index
    %c0_123 = arith.constant 0 : index
    %c0_124 = arith.constant 0 : index
    %211 = vector.load %arg7[%c4_122, %c0_123, %c0_124] : memref<8x128x256xbf16, #tpu.memory_space<vmem>>, vector<1x128x256xbf16>
    %212 = vector.shape_cast %211 : vector<1x128x256xbf16> to vector<128x256xbf16>
    %cst_125 = arith.constant dense<0.000000e+00> : vector<8x256xf32>
    %213 = tpu.matmul %210, %212, %cst_125 {dimension_numbers = #tpu.dot_dimension_numbers<[1], [0], [0], [1], [0, 0, 1, 1], [], []>} : vector<8x128xbf16>, vector<128x256xbf16>, vector<8x256xf32> -> vector<8x256xf32>
    %c4_126 = arith.constant 4 : index
    %c0_127 = arith.constant 0 : index
    %c0_128 = arith.constant 0 : index
    %214 = vector.load %arg8[%c4_126, %c0_127, %c0_128] : memref<8x1x256xf32, #tpu.memory_space<vmem>>, vector<1x1x256xf32>
    %215 = vector.shape_cast %214 : vector<1x1x256xf32> to vector<1x256xf32>
    %216 = vector.broadcast %215 : vector<1x256xf32> to vector<8x256xf32>
    %217 = arith.addf %213, %216 : vector<8x256xf32>
    %218 = vector.extract_strided_slice %217 {offsets = [0, 0], sizes = [8, 128], strides = [1, 1]} : vector<8x256xf32> to vector<8x128xf32>
    %219 = math.tanh %218 : vector<8x128xf32>
    %220 = vector.extract_strided_slice %217 {offsets = [0, 128], sizes = [8, 128], strides = [1, 1]} : vector<8x256xf32> to vector<8x128xf32>
    %221 = math.exp %219 : vector<8x128xf32>
    %222 = vector.broadcast %7 : vector<1x128xf32> to vector<8x128xf32>
    %223 = arith.mulf %222, %221 : vector<8x128xf32>
    %224 = vector.broadcast %3 : vector<1x128xf32> to vector<8x128xf32>
    %225 = arith.addf %224, %223 : vector<8x128xf32>
    %226 = arith.mulf %184, %225 : vector<8x128xf32>
    %227 = vector.broadcast %7 : vector<1x128xf32> to vector<8x128xf32>
    %228 = arith.mulf %227, %220 : vector<8x128xf32>
    %229 = arith.addf %226, %228 : vector<8x128xf32>
    %230 = vector.broadcast %7 : vector<1x128xf32> to vector<8x128xf32>
    %231 = arith.mulf %230, %219 : vector<8x128xf32>
    %cst_129 = arith.constant dense<0.000000e+00> : vector<8xf32>
    %232 = vector.multi_reduction <add>, %231, %cst_129 [1] : vector<8x128xf32> to vector<8xf32>
    %233 = vector.shape_cast %232 : vector<8xf32> to vector<8x1xf32>
    %234 = arith.addf %189, %233 : vector<8x1xf32>
    %235 = arith.truncf %229 : vector<8x128xf32> to vector<8x128xbf16>
    %c5 = arith.constant 5 : index
    %c0_130 = arith.constant 0 : index
    %c0_131 = arith.constant 0 : index
    %236 = vector.load %arg3[%c5, %c0_130, %c0_131] : memref<8x128x128xbf16, #tpu.memory_space<vmem>>, vector<1x128x128xbf16>
    %237 = vector.shape_cast %236 : vector<1x128x128xbf16> to vector<128x128xbf16>
    %cst_132 = arith.constant dense<0.000000e+00> : vector<8x128xf32>
    %238 = tpu.matmul %235, %237, %cst_132 {dimension_numbers = #tpu.dot_dimension_numbers<[1], [0], [0], [1], [0, 0, 1, 1], [], []>} : vector<8x128xbf16>, vector<128x128xbf16>, vector<8x128xf32> -> vector<8x128xf32>
    %c5_133 = arith.constant 5 : index
    %c0_134 = arith.constant 0 : index
    %c0_135 = arith.constant 0 : index
    %239 = vector.load %arg4[%c5_133, %c0_134, %c0_135] : memref<8x1x128xf32, #tpu.memory_space<vmem>>, vector<1x1x128xf32>
    %240 = vector.shape_cast %239 : vector<1x1x128xf32> to vector<1x128xf32>
    %241 = vector.broadcast %240 : vector<1x128xf32> to vector<8x128xf32>
    %242 = arith.addf %238, %241 : vector<8x128xf32>
    %cst_136 = arith.constant 0.000000e+00 : f32
    %243 = vector.broadcast %cst_136 : f32 to vector<8x128xf32>
    %244 = arith.maximumf %242, %243 : vector<8x128xf32>
    %245 = arith.truncf %244 : vector<8x128xf32> to vector<8x128xbf16>
    %c5_137 = arith.constant 5 : index
    %c0_138 = arith.constant 0 : index
    %c0_139 = arith.constant 0 : index
    %246 = vector.load %arg5[%c5_137, %c0_138, %c0_139] : memref<8x128x128xbf16, #tpu.memory_space<vmem>>, vector<1x128x128xbf16>
    %247 = vector.shape_cast %246 : vector<1x128x128xbf16> to vector<128x128xbf16>
    %cst_140 = arith.constant dense<0.000000e+00> : vector<8x128xf32>
    %248 = tpu.matmul %245, %247, %cst_140 {dimension_numbers = #tpu.dot_dimension_numbers<[1], [0], [0], [1], [0, 0, 1, 1], [], []>} : vector<8x128xbf16>, vector<128x128xbf16>, vector<8x128xf32> -> vector<8x128xf32>
    %c5_141 = arith.constant 5 : index
    %c0_142 = arith.constant 0 : index
    %c0_143 = arith.constant 0 : index
    %249 = vector.load %arg6[%c5_141, %c0_142, %c0_143] : memref<8x1x128xf32, #tpu.memory_space<vmem>>, vector<1x1x128xf32>
    %250 = vector.shape_cast %249 : vector<1x1x128xf32> to vector<1x128xf32>
    %251 = vector.broadcast %250 : vector<1x128xf32> to vector<8x128xf32>
    %252 = arith.addf %248, %251 : vector<8x128xf32>
    %cst_144 = arith.constant 0.000000e+00 : f32
    %253 = vector.broadcast %cst_144 : f32 to vector<8x128xf32>
    %254 = arith.maximumf %252, %253 : vector<8x128xf32>
    %255 = arith.truncf %254 : vector<8x128xf32> to vector<8x128xbf16>
    %c5_145 = arith.constant 5 : index
    %c0_146 = arith.constant 0 : index
    %c0_147 = arith.constant 0 : index
    %256 = vector.load %arg7[%c5_145, %c0_146, %c0_147] : memref<8x128x256xbf16, #tpu.memory_space<vmem>>, vector<1x128x256xbf16>
    %257 = vector.shape_cast %256 : vector<1x128x256xbf16> to vector<128x256xbf16>
    %cst_148 = arith.constant dense<0.000000e+00> : vector<8x256xf32>
    %258 = tpu.matmul %255, %257, %cst_148 {dimension_numbers = #tpu.dot_dimension_numbers<[1], [0], [0], [1], [0, 0, 1, 1], [], []>} : vector<8x128xbf16>, vector<128x256xbf16>, vector<8x256xf32> -> vector<8x256xf32>
    %c5_149 = arith.constant 5 : index
    %c0_150 = arith.constant 0 : index
    %c0_151 = arith.constant 0 : index
    %259 = vector.load %arg8[%c5_149, %c0_150, %c0_151] : memref<8x1x256xf32, #tpu.memory_space<vmem>>, vector<1x1x256xf32>
    %260 = vector.shape_cast %259 : vector<1x1x256xf32> to vector<1x256xf32>
    %261 = vector.broadcast %260 : vector<1x256xf32> to vector<8x256xf32>
    %262 = arith.addf %258, %261 : vector<8x256xf32>
    %263 = vector.extract_strided_slice %262 {offsets = [0, 0], sizes = [8, 128], strides = [1, 1]} : vector<8x256xf32> to vector<8x128xf32>
    %264 = math.tanh %263 : vector<8x128xf32>
    %265 = vector.extract_strided_slice %262 {offsets = [0, 128], sizes = [8, 128], strides = [1, 1]} : vector<8x256xf32> to vector<8x128xf32>
    %266 = math.exp %264 : vector<8x128xf32>
    %267 = vector.broadcast %9 : vector<1x128xf32> to vector<8x128xf32>
    %268 = arith.mulf %267, %266 : vector<8x128xf32>
    %269 = vector.broadcast %5 : vector<1x128xf32> to vector<8x128xf32>
    %270 = arith.addf %269, %268 : vector<8x128xf32>
    %271 = arith.mulf %229, %270 : vector<8x128xf32>
    %272 = vector.broadcast %9 : vector<1x128xf32> to vector<8x128xf32>
    %273 = arith.mulf %272, %265 : vector<8x128xf32>
    %274 = arith.addf %271, %273 : vector<8x128xf32>
    %275 = vector.broadcast %9 : vector<1x128xf32> to vector<8x128xf32>
    %276 = arith.mulf %275, %264 : vector<8x128xf32>
    %cst_152 = arith.constant dense<0.000000e+00> : vector<8xf32>
    %277 = vector.multi_reduction <add>, %276, %cst_152 [1] : vector<8x128xf32> to vector<8xf32>
    %278 = vector.shape_cast %277 : vector<8xf32> to vector<8x1xf32>
    %279 = arith.addf %234, %278 : vector<8x1xf32>
    %280 = arith.truncf %274 : vector<8x128xf32> to vector<8x128xbf16>
    %c6 = arith.constant 6 : index
    %c0_153 = arith.constant 0 : index
    %c0_154 = arith.constant 0 : index
    %281 = vector.load %arg3[%c6, %c0_153, %c0_154] : memref<8x128x128xbf16, #tpu.memory_space<vmem>>, vector<1x128x128xbf16>
    %282 = vector.shape_cast %281 : vector<1x128x128xbf16> to vector<128x128xbf16>
    %cst_155 = arith.constant dense<0.000000e+00> : vector<8x128xf32>
    %283 = tpu.matmul %280, %282, %cst_155 {dimension_numbers = #tpu.dot_dimension_numbers<[1], [0], [0], [1], [0, 0, 1, 1], [], []>} : vector<8x128xbf16>, vector<128x128xbf16>, vector<8x128xf32> -> vector<8x128xf32>
    %c6_156 = arith.constant 6 : index
    %c0_157 = arith.constant 0 : index
    %c0_158 = arith.constant 0 : index
    %284 = vector.load %arg4[%c6_156, %c0_157, %c0_158] : memref<8x1x128xf32, #tpu.memory_space<vmem>>, vector<1x1x128xf32>
    %285 = vector.shape_cast %284 : vector<1x1x128xf32> to vector<1x128xf32>
    %286 = vector.broadcast %285 : vector<1x128xf32> to vector<8x128xf32>
    %287 = arith.addf %283, %286 : vector<8x128xf32>
    %cst_159 = arith.constant 0.000000e+00 : f32
    %288 = vector.broadcast %cst_159 : f32 to vector<8x128xf32>
    %289 = arith.maximumf %287, %288 : vector<8x128xf32>
    %290 = arith.truncf %289 : vector<8x128xf32> to vector<8x128xbf16>
    %c6_160 = arith.constant 6 : index
    %c0_161 = arith.constant 0 : index
    %c0_162 = arith.constant 0 : index
    %291 = vector.load %arg5[%c6_160, %c0_161, %c0_162] : memref<8x128x128xbf16, #tpu.memory_space<vmem>>, vector<1x128x128xbf16>
    %292 = vector.shape_cast %291 : vector<1x128x128xbf16> to vector<128x128xbf16>
    %cst_163 = arith.constant dense<0.000000e+00> : vector<8x128xf32>
    %293 = tpu.matmul %290, %292, %cst_163 {dimension_numbers = #tpu.dot_dimension_numbers<[1], [0], [0], [1], [0, 0, 1, 1], [], []>} : vector<8x128xbf16>, vector<128x128xbf16>, vector<8x128xf32> -> vector<8x128xf32>
    %c6_164 = arith.constant 6 : index
    %c0_165 = arith.constant 0 : index
    %c0_166 = arith.constant 0 : index
    %294 = vector.load %arg6[%c6_164, %c0_165, %c0_166] : memref<8x1x128xf32, #tpu.memory_space<vmem>>, vector<1x1x128xf32>
    %295 = vector.shape_cast %294 : vector<1x1x128xf32> to vector<1x128xf32>
    %296 = vector.broadcast %295 : vector<1x128xf32> to vector<8x128xf32>
    %297 = arith.addf %293, %296 : vector<8x128xf32>
    %cst_167 = arith.constant 0.000000e+00 : f32
    %298 = vector.broadcast %cst_167 : f32 to vector<8x128xf32>
    %299 = arith.maximumf %297, %298 : vector<8x128xf32>
    %300 = arith.truncf %299 : vector<8x128xf32> to vector<8x128xbf16>
    %c6_168 = arith.constant 6 : index
    %c0_169 = arith.constant 0 : index
    %c0_170 = arith.constant 0 : index
    %301 = vector.load %arg7[%c6_168, %c0_169, %c0_170] : memref<8x128x256xbf16, #tpu.memory_space<vmem>>, vector<1x128x256xbf16>
    %302 = vector.shape_cast %301 : vector<1x128x256xbf16> to vector<128x256xbf16>
    %cst_171 = arith.constant dense<0.000000e+00> : vector<8x256xf32>
    %303 = tpu.matmul %300, %302, %cst_171 {dimension_numbers = #tpu.dot_dimension_numbers<[1], [0], [0], [1], [0, 0, 1, 1], [], []>} : vector<8x128xbf16>, vector<128x256xbf16>, vector<8x256xf32> -> vector<8x256xf32>
    %c6_172 = arith.constant 6 : index
    %c0_173 = arith.constant 0 : index
    %c0_174 = arith.constant 0 : index
    %304 = vector.load %arg8[%c6_172, %c0_173, %c0_174] : memref<8x1x256xf32, #tpu.memory_space<vmem>>, vector<1x1x256xf32>
    %305 = vector.shape_cast %304 : vector<1x1x256xf32> to vector<1x256xf32>
    %306 = vector.broadcast %305 : vector<1x256xf32> to vector<8x256xf32>
    %307 = arith.addf %303, %306 : vector<8x256xf32>
    %308 = vector.extract_strided_slice %307 {offsets = [0, 0], sizes = [8, 128], strides = [1, 1]} : vector<8x256xf32> to vector<8x128xf32>
    %309 = math.tanh %308 : vector<8x128xf32>
    %310 = vector.extract_strided_slice %307 {offsets = [0, 128], sizes = [8, 128], strides = [1, 1]} : vector<8x256xf32> to vector<8x128xf32>
    %311 = math.exp %309 : vector<8x128xf32>
    %312 = vector.broadcast %7 : vector<1x128xf32> to vector<8x128xf32>
    %313 = arith.mulf %312, %311 : vector<8x128xf32>
    %314 = vector.broadcast %3 : vector<1x128xf32> to vector<8x128xf32>
    %315 = arith.addf %314, %313 : vector<8x128xf32>
    %316 = arith.mulf %274, %315 : vector<8x128xf32>
    %317 = vector.broadcast %7 : vector<1x128xf32> to vector<8x128xf32>
    %318 = arith.mulf %317, %310 : vector<8x128xf32>
    %319 = arith.addf %316, %318 : vector<8x128xf32>
    %320 = vector.broadcast %7 : vector<1x128xf32> to vector<8x128xf32>
    %321 = arith.mulf %320, %309 : vector<8x128xf32>
    %cst_175 = arith.constant dense<0.000000e+00> : vector<8xf32>
    %322 = vector.multi_reduction <add>, %321, %cst_175 [1] : vector<8x128xf32> to vector<8xf32>
    %323 = vector.shape_cast %322 : vector<8xf32> to vector<8x1xf32>
    %324 = arith.addf %279, %323 : vector<8x1xf32>
    %325 = arith.truncf %319 : vector<8x128xf32> to vector<8x128xbf16>
    %c7 = arith.constant 7 : index
    %c0_176 = arith.constant 0 : index
    %c0_177 = arith.constant 0 : index
    %326 = vector.load %arg3[%c7, %c0_176, %c0_177] : memref<8x128x128xbf16, #tpu.memory_space<vmem>>, vector<1x128x128xbf16>
    %327 = vector.shape_cast %326 : vector<1x128x128xbf16> to vector<128x128xbf16>
    %cst_178 = arith.constant dense<0.000000e+00> : vector<8x128xf32>
    %328 = tpu.matmul %325, %327, %cst_178 {dimension_numbers = #tpu.dot_dimension_numbers<[1], [0], [0], [1], [0, 0, 1, 1], [], []>} : vector<8x128xbf16>, vector<128x128xbf16>, vector<8x128xf32> -> vector<8x128xf32>
    %c7_179 = arith.constant 7 : index
    %c0_180 = arith.constant 0 : index
    %c0_181 = arith.constant 0 : index
    %329 = vector.load %arg4[%c7_179, %c0_180, %c0_181] : memref<8x1x128xf32, #tpu.memory_space<vmem>>, vector<1x1x128xf32>
    %330 = vector.shape_cast %329 : vector<1x1x128xf32> to vector<1x128xf32>
    %331 = vector.broadcast %330 : vector<1x128xf32> to vector<8x128xf32>
    %332 = arith.addf %328, %331 : vector<8x128xf32>
    %cst_182 = arith.constant 0.000000e+00 : f32
    %333 = vector.broadcast %cst_182 : f32 to vector<8x128xf32>
    %334 = arith.maximumf %332, %333 : vector<8x128xf32>
    %335 = arith.truncf %334 : vector<8x128xf32> to vector<8x128xbf16>
    %c7_183 = arith.constant 7 : index
    %c0_184 = arith.constant 0 : index
    %c0_185 = arith.constant 0 : index
    %336 = vector.load %arg5[%c7_183, %c0_184, %c0_185] : memref<8x128x128xbf16, #tpu.memory_space<vmem>>, vector<1x128x128xbf16>
    %337 = vector.shape_cast %336 : vector<1x128x128xbf16> to vector<128x128xbf16>
    %cst_186 = arith.constant dense<0.000000e+00> : vector<8x128xf32>
    %338 = tpu.matmul %335, %337, %cst_186 {dimension_numbers = #tpu.dot_dimension_numbers<[1], [0], [0], [1], [0, 0, 1, 1], [], []>} : vector<8x128xbf16>, vector<128x128xbf16>, vector<8x128xf32> -> vector<8x128xf32>
    %c7_187 = arith.constant 7 : index
    %c0_188 = arith.constant 0 : index
    %c0_189 = arith.constant 0 : index
    %339 = vector.load %arg6[%c7_187, %c0_188, %c0_189] : memref<8x1x128xf32, #tpu.memory_space<vmem>>, vector<1x1x128xf32>
    %340 = vector.shape_cast %339 : vector<1x1x128xf32> to vector<1x128xf32>
    %341 = vector.broadcast %340 : vector<1x128xf32> to vector<8x128xf32>
    %342 = arith.addf %338, %341 : vector<8x128xf32>
    %cst_190 = arith.constant 0.000000e+00 : f32
    %343 = vector.broadcast %cst_190 : f32 to vector<8x128xf32>
    %344 = arith.maximumf %342, %343 : vector<8x128xf32>
    %345 = arith.truncf %344 : vector<8x128xf32> to vector<8x128xbf16>
    %c7_191 = arith.constant 7 : index
    %c0_192 = arith.constant 0 : index
    %c0_193 = arith.constant 0 : index
    %346 = vector.load %arg7[%c7_191, %c0_192, %c0_193] : memref<8x128x256xbf16, #tpu.memory_space<vmem>>, vector<1x128x256xbf16>
    %347 = vector.shape_cast %346 : vector<1x128x256xbf16> to vector<128x256xbf16>
    %cst_194 = arith.constant dense<0.000000e+00> : vector<8x256xf32>
    %348 = tpu.matmul %345, %347, %cst_194 {dimension_numbers = #tpu.dot_dimension_numbers<[1], [0], [0], [1], [0, 0, 1, 1], [], []>} : vector<8x128xbf16>, vector<128x256xbf16>, vector<8x256xf32> -> vector<8x256xf32>
    %c7_195 = arith.constant 7 : index
    %c0_196 = arith.constant 0 : index
    %c0_197 = arith.constant 0 : index
    %349 = vector.load %arg8[%c7_195, %c0_196, %c0_197] : memref<8x1x256xf32, #tpu.memory_space<vmem>>, vector<1x1x256xf32>
    %350 = vector.shape_cast %349 : vector<1x1x256xf32> to vector<1x256xf32>
    %351 = vector.broadcast %350 : vector<1x256xf32> to vector<8x256xf32>
    %352 = arith.addf %348, %351 : vector<8x256xf32>
    %353 = vector.extract_strided_slice %352 {offsets = [0, 0], sizes = [8, 128], strides = [1, 1]} : vector<8x256xf32> to vector<8x128xf32>
    %354 = math.tanh %353 : vector<8x128xf32>
    %355 = vector.extract_strided_slice %352 {offsets = [0, 128], sizes = [8, 128], strides = [1, 1]} : vector<8x256xf32> to vector<8x128xf32>
    %356 = math.exp %354 : vector<8x128xf32>
    %357 = vector.broadcast %9 : vector<1x128xf32> to vector<8x128xf32>
    %358 = arith.mulf %357, %356 : vector<8x128xf32>
    %359 = vector.broadcast %5 : vector<1x128xf32> to vector<8x128xf32>
    %360 = arith.addf %359, %358 : vector<8x128xf32>
    %361 = arith.mulf %319, %360 : vector<8x128xf32>
    %362 = vector.broadcast %9 : vector<1x128xf32> to vector<8x128xf32>
    %363 = arith.mulf %362, %355 : vector<8x128xf32>
    %364 = arith.addf %361, %363 : vector<8x128xf32>
    %365 = vector.broadcast %9 : vector<1x128xf32> to vector<8x128xf32>
    %366 = arith.mulf %365, %354 : vector<8x128xf32>
    %cst_198 = arith.constant dense<0.000000e+00> : vector<8xf32>
    %367 = vector.multi_reduction <add>, %366, %cst_198 [1] : vector<8x128xf32> to vector<8xf32>
    %368 = vector.shape_cast %367 : vector<8xf32> to vector<8x1xf32>
    %369 = arith.addf %324, %368 : vector<8x1xf32>
    %c0_199 = arith.constant 0 : index
    %c0_200 = arith.constant 0 : index
    %370 = vector.load %arg11[%c0_199, %c0_200] : memref<8x128xf32, #tpu.memory_space<vmem>>, vector<8x128xf32>
    tpu.vector_store %arg11[%c0_199, %c0_200], %364 {strides = array<i32>} : memref<8x128xf32, #tpu.memory_space<vmem>>, vector<8x128xf32>,
    %c0_201 = arith.constant 0 : index
    %c0_202 = arith.constant 0 : index
    %371 = vector.load %arg12[%c0_201, %c0_202] : memref<8x1xf32, #tpu.memory_space<vmem>>, vector<8x1xf32>
    tpu.vector_store %arg12[%c0_201, %c0_202], %369 {strides = array<i32>} : memref<8x1xf32, #tpu.memory_space<vmem>>, vector<8x1xf32>,
    return
  }
  func.func @transform_0(%arg0: i32) -> (i32, i32, i32) {
    %c0_i32 = arith.constant 0 : i32
    %c0_i32_0 = arith.constant 0 : i32
    %c0_i32_1 = arith.constant 0 : i32
    %c0_i32_2 = arith.constant 0 : i32
    return %c0_i32, %c0_i32_0, %c0_i32_1 : i32, i32, i32
  }
  func.func @transform_1(%arg0: i32) -> (i32, i32, i32) {
    %c0_i32 = arith.constant 0 : i32
    %c0_i32_0 = arith.constant 0 : i32
    %c0_i32_1 = arith.constant 0 : i32
    %c0_i32_2 = arith.constant 0 : i32
    return %c0_i32, %c0_i32_0, %c0_i32_1 : i32, i32, i32
  }
  func.func @transform_2(%arg0: i32) -> (i32, i32, i32) {
    %c0_i32 = arith.constant 0 : i32
    %c0_i32_0 = arith.constant 0 : i32
    %c0_i32_1 = arith.constant 0 : i32
    %c0_i32_2 = arith.constant 0 : i32
    return %c0_i32, %c0_i32_0, %c0_i32_1 : i32, i32, i32
  }
  func.func @transform_3(%arg0: i32) -> (i32, i32, i32) {
    %c0_i32 = arith.constant 0 : i32
    %c0_i32_0 = arith.constant 0 : i32
    %c0_i32_1 = arith.constant 0 : i32
    %c0_i32_2 = arith.constant 0 : i32
    return %c0_i32, %c0_i32_0, %c0_i32_1 : i32, i32, i32
  }
  func.func @transform_4(%arg0: i32) -> (i32, i32, i32) {
    %c0_i32 = arith.constant 0 : i32
    %c0_i32_0 = arith.constant 0 : i32
    %c0_i32_1 = arith.constant 0 : i32
    %c0_i32_2 = arith.constant 0 : i32
    return %c0_i32, %c0_i32_0, %c0_i32_1 : i32, i32, i32
  }
  func.func @transform_5(%arg0: i32) -> (i32, i32, i32) {
    %c0_i32 = arith.constant 0 : i32
    %c0_i32_0 = arith.constant 0 : i32
    %c0_i32_1 = arith.constant 0 : i32
    %c0_i32_2 = arith.constant 0 : i32
    return %c0_i32, %c0_i32_0, %c0_i32_1 : i32, i32, i32
  }
  func.func @transform_6(%arg0: i32) -> (i32, i32, i32) {
    %c0_i32 = arith.constant 0 : i32
    %c0_i32_0 = arith.constant 0 : i32
    %c0_i32_1 = arith.constant 0 : i32
    %c0_i32_2 = arith.constant 0 : i32
    return %c0_i32, %c0_i32_0, %c0_i32_1 : i32, i32, i32
  }
  func.func @transform_7(%arg0: i32) -> (i32, i32, i32) {
    %c0_i32 = arith.constant 0 : i32
    %c0_i32_0 = arith.constant 0 : i32
    %c0_i32_1 = arith.constant 0 : i32
    %c0_i32_2 = arith.constant 0 : i32
    return %c0_i32, %c0_i32_0, %c0_i32_1 : i32, i32, i32
  }
  func.func @transform_8(%arg0: i32) -> (i32, i32) {
    %c0_i32 = arith.constant 0 : i32
    %c0_i32_0 = arith.constant 0 : i32
    %c0_i32_1 = arith.constant 0 : i32
    return %c0_i32, %c0_i32_0 : i32, i32
  }
  func.func @transform_9(%arg0: i32) -> (i32, i32) {
    %c0_i32 = arith.constant 0 : i32
    %c0_i32_0 = arith.constant 0 : i32
    %c0_i32_1 = arith.constant 0 : i32
    return %c0_i32, %c0_i32_0 : i32, i32
  }
  func.func @transform_10(%arg0: i32) -> (i32, i32) {
    %c0_i32 = arith.constant 0 : i32
    %c0_i32_0 = arith.constant 0 : i32
    %c0_i32_1 = arith.constant 0 : i32
    return %c0_i32, %c0_i32_0 : i32, i32
  }
  func.func @transform_11(%arg0: i32) -> (i32, i32) {
    %c0_i32 = arith.constant 0 : i32
    %c0_i32_0 = arith.constant 0 : i32
    %c0_i32_1 = arith.constant 0 : i32
    return %c0_i32, %c0_i32_0 : i32, i32
  }
}

</mosaic_0001>

<bundles_post_ra>
// kernel: flow_forward.1
= control target key start
LH: loop header
LB: loop body
LE: loop exit
PB: predicated region body
PF: predicated region fallthrough
CT: control target
= control target key end

     0   :  { %17 = vsyncpa [#allocation3], 0  ;;  %s5040_s0 = inlined_call_operand.hbm [shape: f32[2,1,128], index: 0, kind: input, shape index: {}]   ;;  %s5041_s1 = inlined_call_operand.hbm [shape: f32[2,1,128], index: 1, kind: input, shape index: {}]   ;;  %s5042_s2 = inlined_call_operand.hbm [shape: bf16[8,128,128], index: 2, kind: input, shape index: {}]   ;;  %s5043_s3 = inlined_call_operand.vmem [shape: f32[8,1,128], index: 3, kind: input, shape index: {}]   ;;  %s5044_s4 = inlined_call_operand.hbm [shape: bf16[8,128,128], index: 4, kind: input, shape index: {}]   ;;  %s5045_s5 = inlined_call_operand.vmem [shape: f32[8,1,128], index: 5, kind: input, shape index: {}]   ;;  %s5046_s6 = inlined_call_operand.hbm [shape: bf16[8,128,256], index: 6, kind: input, shape index: {}]   ;;  %s5047_s7 = inlined_call_operand.vmem [shape: f32[8,1,256], index: 7, kind: input, shape index: {}]   ;;  %s5048_s8 = inlined_call_operand.vmem [shape: f32[8,128], index: 8, kind: input, shape index: {}, may-alias: {8,10}]   ;;  %s5049_s9 = inlined_call_operand.vmem [shape: f32[8,1], index: 9, kind: input, shape index: {}, may-alias: {9,11}]   ;;  %s5050_s10 = inlined_call_operand.vmem [shape: f32[8,128], index: 10, kind: output, shape index: {0}, may-alias: {8,10}]   ;;  %s5051_s11 = inlined_call_operand.vmem [shape: f32[8,1], index: 11, kind: output, shape index: {1}, may-alias: {9,11}]  }
   0x1   :  { %18 = vsyncpa [#allocation5], 0 }
   0x2   :  { %19 = vsyncpa [#allocation8], 0  ;;  %s4545_s17 = smov [#allocation4]   ;;  %s4429_s21 = scalar_lea.hbm %s5041_s1, 32 }
   0x3   :  { %s37_s18 = sshll.u32 %s4545_s17, 4  ;;  %p4430_p0 = scmp.ne.s32.totalorder %s5041_s1, %s4429_s21  ;;  %s38_s18 = int_to_ptr.vmem [resolvable:$true] %s37_s18 }
   0x4   :  { %p4433_p1 = scmp.lt.u32.totalorder %s4429_s21, %s5041_s1 }
   0x6   :  { %p4435_p2 = pnand %p4433_p1, %p4430_p0 }
   0x8   :  { %4438 = shalt.err (!%p4435_p2)
}
   0x9   :  { %s4439_s26 = scalar_lea.vmem %s38_s18, 32  ;;  %p4444_p4 = scmp.lt.s32.totalorder %s38_s18, %s38_s18 }
   0xa   :  { %p4440_p3 = scmp.ne.s32.totalorder %s38_s18, %s4439_s26  ;;  %p4445_p5 = scmp.lt.s32.totalorder %s4439_s26, %s4439_s26 }
   0xc   :  { %p4446_p6 = por %p4445_p5, %p4444_p4 }
   0xe   :  { %p4447_p7 = pnand %p4446_p6, %p4440_p3 }
  0x10   :  { %4450 = shalt.err (!%p4447_p7)
}
  0x11   :  { %s4546_s27 = smov 16   ;;  %s4547_s28 = smov 1  }
  0x12   :  { %43 = dma.hbm_to_vmem [thread:$0]  %s5041_s1, 32, %s38_s18, [#allocation5], %s4546_s27, %s4546_s27, %s4547_s28  }
  0x13   :  { %s4548_s12 = smov [#allocation7]   ;;  %s4549_s14 = smov [#allocation2]  }
  0x14   :  { %s63_s13 = sshll.u32 %s4548_s12, 4  ;;  %s25_s15 = sshll.u32 %s4549_s14, 4  ;;  %s64_s13 = int_to_ptr.vmem [resolvable:$true] %s63_s13  ;;  %s26_s15 = int_to_ptr.vmem [resolvable:$true] %s25_s15 }
  0x15   :  { %s4451_s19 = scalar_lea.hbm %s5044_s4, 8192 }
  0x16   :  { %p4452_p8 = scmp.ne.s32.totalorder %s5044_s4, %s4451_s19  ;;  %p4455_p9 = scmp.lt.u32.totalorder %s4451_s19, %s5044_s4 }
  0x18   :  { %p4457_p10 = pnand %p4455_p9, %p4452_p8 }
  0x1a   :  { %4460 = shalt.err (!%p4457_p10)
}
  0x1b   :  { %s4461_s1 = scalar_lea.vmem %s64_s13, 8192  ;;  %p4466_p12 = scmp.lt.s32.totalorder %s64_s13, %s64_s13 }
  0x1c   :  { %p4462_p11 = scmp.ne.s32.totalorder %s64_s13, %s4461_s1  ;;  %p4467_p13 = scmp.lt.s32.totalorder %s4461_s1, %s4461_s1 }
  0x1e   :  { %p4468_p0 = por %p4467_p13, %p4466_p12 }
  0x20   :  { %p4469_p1 = pnand %p4468_p0, %p4462_p11 }
  0x22   :  { %4472 = shalt.err (!%p4469_p1)
}
  0x23   :  { %s4550_s18 = smov 64   ;;  %s4551_s24 = smov 4  }
  0x24   :  { %69 = dma.hbm_to_vmem [thread:$0]  %s5044_s4, 8192, %s64_s13, [#allocation8], %s4550_s18, %s4550_s18, %s4551_s24  }
  0x25   :  { %s4473_s12 = scalar_lea.hbm %s5040_s0, 32 }
  0x26   :  { %p4474_p2 = scmp.ne.s32.totalorder %s5040_s0, %s4473_s12  ;;  %p4477_p3 = scmp.lt.u32.totalorder %s4473_s12, %s5040_s0 }
  0x28   :  { %p4479_p4 = pnand %p4477_p3, %p4474_p2 }
  0x2a   :  { %4482 = shalt.err (!%p4479_p4)
}
  0x2b   :  { %s4483_s20 = scalar_lea.vmem %s26_s15, 32  ;;  %p4488_p6 = scmp.lt.s32.totalorder %s26_s15, %s26_s15 }
  0x2c   :  { %p4484_p5 = scmp.ne.s32.totalorder %s26_s15, %s4483_s20  ;;  %p4489_p7 = scmp.lt.s32.totalorder %s4483_s20, %s4483_s20 }
  0x2e   :  { %p4490_p8 = por %p4489_p7, %p4488_p6 }
  0x30   :  { %p4491_p9 = pnand %p4490_p8, %p4484_p5 }
  0x32   :  { %4494 = shalt.err (!%p4491_p9)
}
  0x33   :  { %31 = dma.hbm_to_vmem [thread:$0]  %s5040_s0, 32, %s26_s15, [#allocation3], %s4546_s27, %s4546_s27, %s4547_s28  }
  0x34   :  { %s4552_s21 = smov [#allocation6]   ;;  %s4553_s23 = smov [#allocation9]  }
  0x35   :  { %s49_s22 = sshll.u32 %s4552_s21, 4  ;;  %s77_s1 = sshll.u32 %s4553_s23, 4  ;;  %s50_s22 = int_to_ptr.vmem [resolvable:$true] %s49_s22  ;;  %s78_s1 = int_to_ptr.vmem [resolvable:$true] %s77_s1 }
  0x36   :  { %s4495_s29 = scalar_lea.hbm %s5042_s2, 8192 }
  0x37   :  { %p4496_p10 = scmp.ne.s32.totalorder %s5042_s2, %s4495_s29  ;;  %p4499_p11 = scmp.lt.u32.totalorder %s4495_s29, %s5042_s2 }
  0x39   :  { %p4501_p12 = pnand %p4499_p11, %p4496_p10 }
  0x3b   :  { %4504 = shalt.err (!%p4501_p12)
}
  0x3c   :  { %s4505_s0 = scalar_lea.vmem %s50_s22, 8192  ;;  %p4510_p0 = scmp.lt.s32.totalorder %s50_s22, %s50_s22 }
  0x3d   :  { %p4506_p13 = scmp.ne.s32.totalorder %s50_s22, %s4505_s0  ;;  %p4511_p1 = scmp.lt.s32.totalorder %s4505_s0, %s4505_s0 }
  0x3f   :  { %p4512_p2 = por %p4511_p1, %p4510_p0 }
  0x41   :  { %p4513_p3 = pnand %p4512_p2, %p4506_p13 }
  0x43   :  { %4516 = shalt.err (!%p4513_p3)
}
  0x44   :  { %55 = dma.hbm_to_vmem [thread:$0]  %s5042_s2, 8192, %s50_s22, [#allocation5], %s4550_s18, %s4550_s18, %s4551_s24  }
  0x45   :  { %s4517_s19 = scalar_lea.hbm %s5046_s6, 16384 }
  0x46   :  { %p4518_p4 = scmp.ne.s32.totalorder %s5046_s6, %s4517_s19  ;;  %p4521_p5 = scmp.lt.u32.totalorder %s4517_s19, %s5046_s6 }
  0x48   :  { %p4523_p6 = pnand %p4521_p5, %p4518_p4 }
  0x4a   :  { %4526 = shalt.err (!%p4523_p6)
}
  0x4b   :  { %s4527_s23 = scalar_lea.vmem %s78_s1, 16384  ;;  %p4532_p8 = scmp.lt.s32.totalorder %s78_s1, %s78_s1 }
  0x4c   :  { %p4528_p7 = scmp.ne.s32.totalorder %s78_s1, %s4527_s23  ;;  %p4533_p9 = scmp.lt.s32.totalorder %s4527_s23, %s4527_s23 }
  0x4e   :  { %p4534_p10 = por %p4533_p9, %p4532_p8 }
  0x50   :  { %p4535_p11 = pnand %p4534_p10, %p4528_p7 }
  0x52   :  { %4538 = shalt.err (!%p4535_p11)
}
  0x53   :  { %s4554_s2 = smov 128   ;;  %s4555_s18 = smov 8  }
  0x54   :  { %83 = dma.hbm_to_vmem [thread:$0]  %s5046_s6, 16384, %s78_s1, [#allocation8], %s4554_s2, %s4554_s2, %s4555_s18  }
  0x55   :  { %4539 = dma.done.wait [#allocation3], 32  }
  0x56   :  { %4540 = vsyncadd [#allocation3], 4294967264 }
  0x57   :  { %4541 = dma.done.wait [#allocation5], 8224  }
  0x58   :  { %4542 = vsyncadd [#allocation5], 4294959072 }
  0x59   :  { %4543 = dma.done.wait [#allocation8], 24576  }
  0x5a   :  { %4544 = vsyncadd [#allocation8], 4294942720  ;;  %v4556_v0 = vmov 0.0   ;;  %vm4557_vm0 = vmmov 0   ;;  %v4073_v1 = vld [vmem:[#allocation6] sm:$0xff]   ;;  %v4074_v2 = vld [vmem:[#allocation6 + $0x8] sm:$0xff]   ;;  %v359_v60 = vlaneseq }
  0x5b   :  { %3739 = vmatprep.subr.bf16.mxu0 %v4556_v0  ;;  %3755 = vmatprep.mubr.msk.bf16.mxu0 %vm4557_vm0, %v4556_v0  ;;  %v4075_v3 = vld [vmem:[#allocation6 + $0x10] sm:$0xff]   ;;  %v4081_v4 = vld [vmem:[#allocation7] sm:$0xff]   ;;  %v4076_v5 = vld [vmem:[#allocation6 + $0x18] sm:$0xff]   ;;  %v4558_v43 = vmov 0   ;;  %vm3285_vm1 = vcmask 7168  }
  0x5c   :  { %3759 = vmatprep.subr.bf16.mxu1 %v4556_v0  ;;  %3775 = vmatprep.mubr.msk.bf16.mxu1 %vm4557_vm0, %v4556_v0  ;;  %v4082_v6 = vld [vmem:[#allocation7 + $0x8] sm:$0xff]   ;;  %v4077_v7 = vld [vmem:[#allocation6 + $0x20] sm:$0xff]   ;;  %v4083_v8 = vld [vmem:[#allocation7 + $0x10] sm:$0xff]   ;;  %v360_v61 = vshrl.u32 %v359_v60, 7 }
  0x5d   :  { %3740 = vmatpush3.bf16.msra.mxu0 %v4073_v1  ;;  %3760 = vmatpush3.bf16.msra.mxu1 %v4081_v4  ;;  %v4078_v9 = vld [vmem:[#allocation6 + $0x28] sm:$0xff]   ;;  %v4084_v10 = vld [vmem:[#allocation7 + $0x18] sm:$0xff]   ;;  %v4079_v11 = vld [vmem:[#allocation6 + $0x30] sm:$0xff]  }
  0x5e   :  { %3741 = vmatprep.subr.bf16.mxu0 %v4556_v0  ;;  %3761 = vmatprep.subr.bf16.mxu1 %v4556_v0  ;;  %v4085_v12 = vld [vmem:[#allocation7 + $0x20] sm:$0xff]   ;;  %v4080_v13 = vld [vmem:[#allocation6 + $0x38] sm:$0xff]   ;;  %v4086_v15 = vld [vmem:[#allocation7 + $0x28] sm:$0xff]   ;;  %v4738_v62 = vsub.s32 0, %v360_v61 }
  0x5f   :  { %v4709_v14 = vld [vmem:[%s5048_s8] sm:$0xff]  ;;  %v4087_v17 = vld [vmem:[#allocation7 + $0x30] sm:$0xff]   ;;  %v4091_v20 = vld [vmem:[#allocation9 + $0x4] ss:$8 sps:$4 sm:$0xff]  }
  0x60   :  { %v114_v16 = vpack.c.bf16 %v4709_v14, %v4709_v14  ;;  %v4088_v18 = vld [vmem:[#allocation7 + $0x38] sm:$0xff]   ;;  %v4089_v19 = vld [vmem:[#allocation9] ss:$8 sps:$4 sm:$0xff]   ;;  %v4097_v23 = vld [vmem:[#allocation9 + $0x24] ss:$8 sps:$4 sm:$0xff]  }
  0x61   :  { %3742 = vmatpush3.bf16.msra.mxu0 %v4074_v2  ;;  %3762 = vmatpush3.bf16.msra.mxu1 %v4082_v6  ;;  %v4094_v21 = vld [vmem:[#allocation9 + $0x14] ss:$8 sps:$4 sm:$0xff]   ;;  %v4092_v22 = vld [vmem:[#allocation9 + $0x10] ss:$8 sps:$4 sm:$0xff]   ;;  %v4095_v24 = vld [vmem:[#allocation9 + $0x20] ss:$8 sps:$4 sm:$0xff]  }
  0x62   :  { %3743 = vmatprep.subr.bf16.mxu0 %v4556_v0  ;;  %3763 = vmatprep.subr.bf16.mxu1 %v4556_v0  ;;  %v4100_v25 = vld [vmem:[#allocation9 + $0x34] ss:$8 sps:$4 sm:$0xff]   ;;  %v4098_v26 = vld [vmem:[#allocation9 + $0x30] ss:$8 sps:$4 sm:$0xff]   ;;  %v4103_v27 = vld [vmem:[#allocation9 + $0x44] ss:$8 sps:$4 sm:$0xff]  }
  0x63   :  { %v4101_v28 = vld [vmem:[#allocation9 + $0x40] ss:$8 sps:$4 sm:$0xff]   ;;  %v4106_v29 = vld [vmem:[#allocation9 + $0x54] ss:$8 sps:$4 sm:$0xff]   ;;  %v4104_v30 = vld [vmem:[#allocation9 + $0x50] ss:$8 sps:$4 sm:$0xff]  }
  0x64   :  { %v4109_v31 = vld [vmem:[#allocation9 + $0x64] ss:$8 sps:$4 sm:$0xff]   ;;  %v4107_v32 = vld [vmem:[#allocation9 + $0x60] ss:$8 sps:$4 sm:$0xff]   ;;  %v3298_v33 = vld [vmem:[%s5043_s3] ss:$0 sm:$0xff] }
  0x65   :  { %3744 = vmatpush3.bf16.msra.mxu0 %v4075_v3  ;;  %3764 = vmatpush3.bf16.msra.mxu1 %v4083_v8  ;;  %v4112_v41 = vld [vmem:[#allocation9 + $0x74] ss:$8 sps:$4 sm:$0xff]   ;;  %v4110_v42 = vld [vmem:[#allocation9 + $0x70] ss:$8 sps:$4 sm:$0xff]   ;;  %v4113_v52 = vld [vmem:[#allocation6 + $0x40] sm:$0xff]  }
  0x66   :  { %3745 = vmatprep.subr.bf16.mxu0 %v4556_v0  ;;  %3765 = vmatprep.subr.bf16.mxu1 %v4556_v0  ;;  %v3307_v44 = vld [vmem:[%s5045_s5] ss:$0 sm:$0xff]  ;;  %v4114_v53 = vld [vmem:[#allocation6 + $0x48] sm:$0xff]   ;;  %v4115_v54 = vld [vmem:[#allocation6 + $0x50] sm:$0xff]  }
  0x67   :  { %v4116_v55 = vld [vmem:[#allocation6 + $0x58] sm:$0xff]   ;;  %v4117_v56 = vld [vmem:[#allocation6 + $0x60] sm:$0xff]   ;;  %v4118_v57 = vld [vmem:[#allocation6 + $0x68] sm:$0xff]  }
  0x68   :  { %v4119_v58 = vld [vmem:[#allocation6 + $0x70] sm:$0xff]   ;;  %v4120_v59 = vld [vmem:[#allocation6 + $0x78] sm:$0xff]  }
  0x69   :  { %3746 = vmatpush3.bf16.msra.mxu0 %v4076_v5  ;;  %3766 = vmatpush3.bf16.msra.mxu1 %v4084_v10  ;;  %v357_v63 = vld [vmem:[%s5047_s7] sm:$0x3]  ;;  %v4744_v8 = vld [vmem:[#allocation4] ss:$0 sm:$0xff] }
  0x6a   :  { %3747 = vmatprep.subr.bf16.mxu0 %v4556_v0  ;;  %3767 = vmatprep.subr.bf16.mxu1 %v4556_v0  ;;  %v362_v1 = vrot.slane %v357_v63, %v4738_v62 }
  0x6d   :  { %3748 = vmatpush3.bf16.msra.mxu0 %v4077_v7  ;;  %3768 = vmatpush3.bf16.msra.mxu1 %v4085_v12 }
  0x6e   :  { %3749 = vmatprep.subr.bf16.mxu0 %v4556_v0  ;;  %3769 = vmatprep.subr.bf16.mxu1 %v4556_v0 }
  0x71   :  { %3750 = vmatpush3.bf16.msra.mxu0 %v4078_v9  ;;  %3770 = vmatpush3.bf16.msra.mxu1 %v4086_v15  ;;  %v4750_v15 = vld [vmem:[#allocation2] ss:$0 sm:$0xff] }
  0x72   :  { %3751 = vmatprep.subr.bf16.mxu0 %v4556_v0  ;;  %3771 = vmatprep.subr.bf16.mxu1 %v4556_v0 }
  0x75   :  { %3752 = vmatpush3.bf16.msra.mxu0 %v4079_v11  ;;  %3772 = vmatpush3.bf16.msra.mxu1 %v4087_v17  ;;  %v4747_v11 = vsub.s32 1, %v360_v61 }
  0x76   :  { %3753 = vmatprep.subr.bf16.mxu0 %v4556_v0  ;;  %3773 = vmatprep.subr.bf16.mxu1 %v4556_v0 }
  0x77   :  { %v366_v12 = vrot.slane %v357_v63, %v4747_v11 }
  0x79   :  { %3754 = vmatpush3.bf16.msra.mxu0 %v4080_v13  ;;  %3774 = vmatpush3.bf16.msra.mxu1 %v4088_v18 }
  0x7a   :  { %3779 = vmatprep.subr.bf16.mxu1 %v4556_v0  ;;  %449 = vmatprep.subr.bf16.mxu0 %v4091_v20 }
  0x7c   :  { %3756 = vmatmul.mubr.bf16.vlgmr.msra.gmra.mrb[0].mxu0 %v114_v16 }
  0x7d   :  { %450 = vmatpush1.bf16.msra.mxu0 %v4089_v19  ;;  %481 = vmatprep.mubr.bf16.mxu0 %v4558_v43  ;;  %v4121_v19 = vld [vmem:[#allocation7 + $0x40] sm:$0xff]  }
  0x7e   :  { %451 = vmatprep.subr.bf16.mxu0 %v4094_v21 }
  0x81   :  { %452 = vmatpush1.bf16.msra.mxu0 %v4092_v22  ;;  %v4122_v22 = vld [vmem:[#allocation7 + $0x48] sm:$0xff]  }
  0x82   :  { %453 = vmatprep.subr.bf16.mxu0 %v4097_v23 }
  0x85   :  { %454 = vmatpush1.bf16.msra.mxu0 %v4095_v24 }
  0x86   :  { %455 = vmatprep.subr.bf16.mxu0 %v4100_v25  ;;  %v4123_v25 = vld [vmem:[#allocation7 + $0x50] sm:$0xff]  }
  0x89   :  { %456 = vmatpush1.bf16.msra.mxu0 %v4098_v26  ;;  %v4125_v26 = vld [vmem:[#allocation7 + $0x60] sm:$0xff]  }
  0x8a   :  { %457 = vmatprep.subr.bf16.mxu0 %v4103_v27  ;;  %v4126_v27 = vld [vmem:[#allocation7 + $0x68] sm:$0xff]  }
  0x8d   :  { %458 = vmatpush1.bf16.msra.mxu0 %v4101_v28  ;;  %v4127_v28 = vld [vmem:[#allocation7 + $0x70] sm:$0xff]  }
  0x8e   :  { %459 = vmatprep.subr.bf16.mxu0 %v4106_v29  ;;  %v4128_v29 = vld [vmem:[#allocation7 + $0x78] sm:$0xff]  }
  0x91   :  { %460 = vmatpush1.bf16.msra.mxu0 %v4104_v30  ;;  %v4129_v30 = vld [vmem:[#allocation9 + $0x80] ss:$8 sps:$4 sm:$0xff]  }
  0x92   :  { %461 = vmatprep.subr.bf16.mxu0 %v4109_v31  ;;  %v4131_v31 = vld [vmem:[#allocation9 + $0x84] ss:$8 sps:$4 sm:$0xff]  }
  0x95   :  { %462 = vmatpush1.bf16.msra.mxu0 %v4107_v32  ;;  %v4134_v32 = vld [vmem:[#allocation9 + $0x94] ss:$8 sps:$4 sm:$0xff]  }
  0x96   :  { %463 = vmatprep.subr.bf16.mxu0 %v4112_v41  ;;  %v4144_v41 = vld [vmem:[#allocation9 + $0xd0] ss:$8 sps:$4 sm:$0xff]  }
  0x99   :  { %464 = vmatpush1.bf16.msra.mxu0 %v4110_v42  ;;  %v4149_v42 = vld [vmem:[#allocation9 + $0xe4] ss:$8 sps:$4 sm:$0xff]  }
  0x9a   :  { %3799 = vmatprep.subr.bf16.mxu0 %v4556_v0 }
 0x14f   :  { %v220_v34 = vpop.f32.mrb[0].mxu0 }
 0x150   :  { %v221_v35 = vadd.f32 %v3298_v33, %v220_v34  ;;  %v3757_v36 = vpop.f32.mrb[1].mxu0  ;;  %v4132_v33 = vld [vmem:[#allocation9 + $0x90] ss:$8 sps:$4 sm:$0xff]   ;;  %v4137_v34 = vld [vmem:[#allocation9 + $0xa4] ss:$8 sps:$4 sm:$0xff]  }
 0x151   :  { %v223_v37 = vpop.f32.mrb[2].mxu0  ;;  %v4140_v36 = vld [vmem:[#allocation9 + $0xb4] ss:$8 sps:$4 sm:$0xff]  }
 0x152   :  { %v226_v38 = vmax.f32 %v221_v35, 0.0  ;;  %v3758_v39 = vpop.f32.mrb[3].mxu0  ;;  %v4135_v35 = vld [vmem:[#allocation9 + $0xa0] ss:$8 sps:$4 sm:$0xff]   ;;  %v4138_v37 = vld [vmem:[#allocation9 + $0xb0] ss:$8 sps:$4 sm:$0xff]  }
 0x153   :  { %v4141_v39 = vld [vmem:[#allocation9 + $0xc0] ss:$8 sps:$4 sm:$0xff]  }
 0x154   :  { %v227_v40 = vpack.c.bf16 %v226_v38, %v226_v38  ;;  %v4143_v38 = vld [vmem:[#allocation9 + $0xc4] ss:$8 sps:$4 sm:$0xff]  }
 0x156   :  { %3776 = vmatmul.mubr.bf16.vlgmr.msra.gmra.mrb[0].mxu1 %v227_v40  ;;  %v4146_v40 = vld [vmem:[#allocation9 + $0xd4] ss:$8 sps:$4 sm:$0xff]  }
 0x157   :  { %3795 = vmatprep.mubr.msk.bf16.mxu1 %vm4557_vm0, %v4556_v0  ;;  %3780 = vmatpush3.bf16.msra.mxu1 %v4113_v52 }
 0x158   :  { %3781 = vmatprep.subr.bf16.mxu1 %v4556_v0 }
 0x15b   :  { %3782 = vmatpush3.bf16.msra.mxu1 %v4114_v53  ;;  %v4152_v53 = vld [vmem:[#allocation9 + $0xf4] ss:$8 sps:$4 sm:$0xff]  }
 0x15c   :  { %3783 = vmatprep.subr.bf16.mxu1 %v4556_v0 }
 0x15f   :  { %3784 = vmatpush3.bf16.msra.mxu1 %v4115_v54  ;;  %v4150_v54 = vld [vmem:[#allocation9 + $0xf0] ss:$8 sps:$4 sm:$0xff]  }
 0x160   :  { %3785 = vmatprep.subr.bf16.mxu1 %v4556_v0 }
 0x163   :  { %3786 = vmatpush3.bf16.msra.mxu1 %v4116_v55  ;;  %v3345_v55 = vld [vmem:[%s5045_s5 + $0x1] ss:$0 sm:$0xff] }
 0x164   :  { %3787 = vmatprep.subr.bf16.mxu1 %v4556_v0 }
 0x167   :  { %3788 = vmatpush3.bf16.msra.mxu1 %v4117_v56 }
 0x168   :  { %3789 = vmatprep.subr.bf16.mxu1 %v4556_v0 }
 0x16b   :  { %3790 = vmatpush3.bf16.msra.mxu1 %v4118_v57 }
 0x16c   :  { %3791 = vmatprep.subr.bf16.mxu1 %v4556_v0 }
 0x16f   :  { %3792 = vmatpush3.bf16.msra.mxu1 %v4119_v58 }
 0x170   :  { %3793 = vmatprep.subr.bf16.mxu1 %v4556_v0 }
 0x173   :  { %3794 = vmatpush3.bf16.msra.mxu1 %v4120_v59 }
 0x174   :  { %855 = vmatprep.subr.bf16.mxu1 %v4131_v31 }
 0x229   :  { %v333_v45 = vpop.f32.mrb[0].mxu1 }
 0x22a   :  { %v334_v46 = vadd.f32 %v3307_v44, %v333_v45  ;;  %v3777_v47 = vpop.f32.mrb[1].mxu1  ;;  %v4147_v44 = vld [vmem:[#allocation9 + $0xe0] ss:$8 sps:$4 sm:$0xff]   ;;  %v3335_v45 = vld [vmem:[%s5043_s3 + $0x1] ss:$0 sm:$0xff] }
 0x22b   :  { %v336_v48 = vpop.f32.mrb[2].mxu1 }
 0x22c   :  { %v339_v49 = vmax.f32 %v334_v46, 0.0  ;;  %v3778_v50 = vpop.f32.mrb[3].mxu1 }
 0x22e   :  { %v340_v51 = vpack.c.bf16 %v339_v49, %v339_v49 }
 0x230   :  { %482 = vmatmul.mubr.bf16.vlgmr.msra.gmra.mrb[4].mxu0 %v340_v51 }
 0x231   :  { %3815 = vmatprep.mubr.msk.bf16.mxu0 %vm4557_vm0, %v4556_v0  ;;  %3800 = vmatpush3.bf16.msra.mxu0 %v4121_v19 }
 0x232   :  { %3801 = vmatprep.subr.bf16.mxu0 %v4556_v0 }
 0x235   :  { %3802 = vmatpush3.bf16.msra.mxu0 %v4122_v22 }
 0x236   :  { %3803 = vmatprep.subr.bf16.mxu0 %v4556_v0 }
 0x239   :  { %3804 = vmatpush3.bf16.msra.mxu0 %v4123_v25 }
 0x23a   :  { %3805 = vmatprep.subr.bf16.mxu0 %v4556_v0 }
 0x303   :  { %v483_v2 = vpop.f32.mrb[4].mxu0 }
 0x304   :  { %v484_v3 = vadd.f32 %v483_v2, %v362_v1  ;;  %v485_v4 = vpop.f32.mrb[5].mxu0  ;;  %v4153_v1 = vld [vmem:[#allocation6 + $0x80] sm:$0xff]   ;;  %v4154_v2 = vld [vmem:[#allocation6 + $0x88] sm:$0xff]  }
 0x305   :  { %v487_v5 = vpop.f32.mrb[6].mxu0  ;;  %v486_v16 = vadd.f32 %v485_v4, %v366_v12  ;;  %v4156_v4 = vld [vmem:[#allocation6 + $0x98] sm:$0xff]  }
 0x306   :  { %4393 = vtanh.f32 %v484_v3  ;;  %v488_v6 = vpop.f32.mrb[7].mxu0  ;;  %v4155_v3 = vld [vmem:[#allocation6 + $0x90] sm:$0xff]   ;;  %v4157_v5 = vld [vmem:[#allocation6 + $0xa0] sm:$0xff]  }
 0x307   :  { %v508_v21 = vmul.f32 %v4744_v8, %v486_v16  ;;  %v4158_v6 = vld [vmem:[#allocation6 + $0xa8] sm:$0xff]  }
 0x310   :  { %v4394_v7 = vpop.eup %4393 }
 0x311   :  { %v491_v9 = vmul.f32 1.442695, %v4394_v7  ;;  %v510_v10 = vmul.f32 %v4394_v7, %v4744_v8  ;;  %v4159_v7 = vld [vmem:[#allocation6 + $0xb0] sm:$0xff]  }
 0x313   :  { %4395 = vpow2.f32 %v491_v9  ;;  %511 = vadd.xlane.f32.xlu0 %v510_v10  ;;  %v4160_v9 = vld [vmem:[#allocation6 + $0xb8] sm:$0xff]  }
 0x314   :  { %v3354_v10 = vld [vmem:[%s5047_s7 + $0x2] sm:$0x3] }
 0x315   :  { %v768_v12 = vrot.slane %v3354_v10, %v4738_v62  ;;  %v772_v25 = vrot.slane %v3354_v10, %v4747_v11 }
 0x31d   :  { %v4396_v13 = vpop.eup %4395 }
 0x31e   :  { %v499_v17 = vmul.f32 %v4396_v13, %v4744_v8 }
 0x320   :  { %v506_v18 = vadd.f32 %v4750_v15, %v499_v17 }
 0x322   :  { %v507_v20 = vmul.f32 %v506_v18, %v4709_v14  ;;  %v4124_v14 = vld [vmem:[#allocation7 + $0x58] sm:$0xff]  }
 0x323   :  { %3806 = vmatpush3.bf16.msra.mxu0 %v4124_v14 }
 0x324   :  { %v4756_v23 = vadd.f32 %v508_v21, %v507_v20  ;;  %3807 = vmatprep.subr.bf16.mxu0 %v4556_v0  ;;  %v4791_v21 = vld [vmem:[#allocation4 + $0x1] ss:$0 sm:$0xff] }
 0x326   :  { %v514_v24 = vpack.c.bf16 %v4756_v23, %v4756_v23 }
 0x327   :  { %3808 = vmatpush3.bf16.msra.mxu0 %v4125_v26  ;;  %v4795_v26 = vld [vmem:[#allocation2 + $0x1] ss:$0 sm:$0xff] }
 0x328   :  { %3796 = vmatmul.mubr.bf16.vlgmr.msra.gmra.mrb[4].mxu1 %v514_v24  ;;  %3809 = vmatprep.subr.bf16.mxu0 %v4556_v0 }
 0x329   :  { %887 = vmatprep.mubr.bf16.mxu1 %v4558_v43  ;;  %856 = vmatpush1.bf16.msra.mxu1 %v4129_v30  ;;  %v4161_v30 = vld [vmem:[#allocation7 + $0x80] sm:$0xff]  }
 0x32a   :  { %857 = vmatprep.subr.bf16.mxu1 %v4134_v32 }
 0x32b   :  { %3810 = vmatpush3.bf16.msra.mxu0 %v4126_v27 }
 0x32c   :  { %3811 = vmatprep.subr.bf16.mxu0 %v4556_v0 }
 0x32d   :  { %858 = vmatpush1.bf16.msra.mxu1 %v4132_v33  ;;  %v4162_v33 = vld [vmem:[#allocation7 + $0x88] sm:$0xff]  }
 0x32e   :  { %859 = vmatprep.subr.bf16.mxu1 %v4137_v34 }
 0x32f   :  { %3812 = vmatpush3.bf16.msra.mxu0 %v4127_v28 }
 0x330   :  { %3813 = vmatprep.subr.bf16.mxu0 %v4556_v0 }
 0x331   :  { %860 = vmatpush1.bf16.msra.mxu1 %v4135_v35 }
 0x332   :  { %861 = vmatprep.subr.bf16.mxu1 %v4140_v36  ;;  %v4163_v36 = vld [vmem:[#allocation7 + $0x90] sm:$0xff]  }
 0x333   :  { %3814 = vmatpush3.bf16.msra.mxu0 %v4128_v29 }
 0x334   :  { %3819 = vmatprep.subr.bf16.mxu0 %v4556_v0 }
 0x335   :  { %862 = vmatpush1.bf16.msra.mxu1 %v4138_v37  ;;  %v4165_v37 = vld [vmem:[#allocation7 + $0xa0] sm:$0xff]  }
 0x336   :  { %863 = vmatprep.subr.bf16.mxu1 %v4143_v38  ;;  %v4166_v38 = vld [vmem:[#allocation7 + $0xa8] sm:$0xff]  }
 0x339   :  { %864 = vmatpush1.bf16.msra.mxu1 %v4141_v39  ;;  %v4167_v39 = vld [vmem:[#allocation7 + $0xb0] sm:$0xff]  }
 0x33a   :  { %865 = vmatprep.subr.bf16.mxu1 %v4146_v40  ;;  %v4168_v40 = vld [vmem:[#allocation7 + $0xb8] sm:$0xff]  }
 0x33d   :  { %866 = vmatpush1.bf16.msra.mxu1 %v4144_v41  ;;  %v4169_v41 = vld [vmem:[#allocation9 + $0x100] ss:$8 sps:$4 sm:$0xff]  }
 0x33e   :  { %867 = vmatprep.subr.bf16.mxu1 %v4149_v42  ;;  %v4171_v42 = vld [vmem:[#allocation9 + $0x104] ss:$8 sps:$4 sm:$0xff]  }
 0x341   :  { %868 = vmatpush1.bf16.msra.mxu1 %v4147_v44  ;;  %v4174_v44 = vld [vmem:[#allocation9 + $0x114] ss:$8 sps:$4 sm:$0xff]  }
 0x342   :  { %869 = vmatprep.subr.bf16.mxu1 %v4152_v53  ;;  %v4184_v53 = vld [vmem:[#allocation9 + $0x150] ss:$8 sps:$4 sm:$0xff]  }
 0x345   :  { %870 = vmatpush1.bf16.msra.mxu1 %v4150_v54  ;;  %v4189_v54 = vld [vmem:[#allocation9 + $0x164] ss:$8 sps:$4 sm:$0xff]  }
 0x346   :  { %3839 = vmatprep.subr.bf16.mxu1 %v4556_v0 }
 0x3fb   :  { %v622_v46 = vpop.f32.mrb[4].mxu1 }
 0x3fc   :  { %v623_v47 = vadd.f32 %v3335_v45, %v622_v46  ;;  %v3797_v48 = vpop.f32.mrb[5].mxu1  ;;  %v4172_v45 = vld [vmem:[#allocation9 + $0x110] ss:$8 sps:$4 sm:$0xff]   ;;  %v4177_v46 = vld [vmem:[#allocation9 + $0x124] ss:$8 sps:$4 sm:$0xff]  }
 0x3fd   :  { %v625_v49 = vpop.f32.mrb[6].mxu1  ;;  %v4180_v48 = vld [vmem:[#allocation9 + $0x134] ss:$8 sps:$4 sm:$0xff]  }
 0x3fe   :  { %v628_v50 = vmax.f32 %v623_v47, 0.0  ;;  %v3798_v51 = vpop.f32.mrb[7].mxu1  ;;  %v4175_v47 = vld [vmem:[#allocation9 + $0x120] ss:$8 sps:$4 sm:$0xff]   ;;  %v4178_v49 = vld [vmem:[#allocation9 + $0x130] ss:$8 sps:$4 sm:$0xff]  }
 0x3ff   :  { %v4181_v51 = vld [vmem:[#allocation9 + $0x140] ss:$8 sps:$4 sm:$0xff]  }
 0x400   :  { %v629_v52 = vpack.c.bf16 %v628_v50, %v628_v50  ;;  %v4183_v50 = vld [vmem:[#allocation9 + $0x144] ss:$8 sps:$4 sm:$0xff]  }
 0x402   :  { %3816 = vmatmul.mubr.bf16.vlgmr.msra.gmra.mrb[8].mxu0 %v629_v52  ;;  %v4186_v52 = vld [vmem:[#allocation9 + $0x154] ss:$8 sps:$4 sm:$0xff]  }
 0x403   :  { %3835 = vmatprep.mubr.msk.bf16.mxu0 %vm4557_vm0, %v4556_v0  ;;  %3820 = vmatpush3.bf16.msra.mxu0 %v4153_v1 }
 0x404   :  { %3821 = vmatprep.subr.bf16.mxu0 %v4556_v0 }
 0x407   :  { %3822 = vmatpush3.bf16.msra.mxu0 %v4154_v2  ;;  %v4192_v2 = vld [vmem:[#allocation9 + $0x174] ss:$8 sps:$4 sm:$0xff]  }
 0x408   :  { %3823 = vmatprep.subr.bf16.mxu0 %v4556_v0 }
 0x40b   :  { %3824 = vmatpush3.bf16.msra.mxu0 %v4155_v3  ;;  %v4190_v3 = vld [vmem:[#allocation9 + $0x170] ss:$8 sps:$4 sm:$0xff]  }
 0x40c   :  { %3825 = vmatprep.subr.bf16.mxu0 %v4556_v0 }
 0x40f   :  { %3826 = vmatpush3.bf16.msra.mxu0 %v4156_v4  ;;  %v3384_v4 = vld [vmem:[%s5045_s5 + $0x2] ss:$0 sm:$0xff] }
 0x410   :  { %3827 = vmatprep.subr.bf16.mxu0 %v4556_v0 }
 0x413   :  { %3828 = vmatpush3.bf16.msra.mxu0 %v4157_v5 }
 0x414   :  { %3829 = vmatprep.subr.bf16.mxu0 %v4556_v0 }
 0x417   :  { %3830 = vmatpush3.bf16.msra.mxu0 %v4158_v6 }
 0x418   :  { %3831 = vmatprep.subr.bf16.mxu0 %v4556_v0 }
 0x41b   :  { %3832 = vmatpush3.bf16.msra.mxu0 %v4159_v7 }
 0x41c   :  { %3833 = vmatprep.subr.bf16.mxu0 %v4556_v0 }
 0x41f   :  { %3834 = vmatpush3.bf16.msra.mxu0 %v4160_v9 }
 0x420   :  { %1261 = vmatprep.subr.bf16.mxu0 %v4171_v42 }
 0x4d5   :  { %v737_v56 = vpop.f32.mrb[8].mxu0 }
 0x4d6   :  { %v738_v57 = vadd.f32 %v3345_v55, %v737_v56  ;;  %v3817_v58 = vpop.f32.mrb[9].mxu0  ;;  %v4187_v55 = vld [vmem:[#allocation9 + $0x160] ss:$8 sps:$4 sm:$0xff]   ;;  %v3374_v56 = vld [vmem:[%s5043_s3 + $0x2] ss:$0 sm:$0xff] }
 0x4d7   :  { %v740_v59 = vpop.f32.mrb[10].mxu0 }
 0x4d8   :  { %v743_v60 = vmax.f32 %v738_v57, 0.0  ;;  %v3818_v61 = vpop.f32.mrb[11].mxu0 }
 0x4da   :  { %v744_v63 = vpack.c.bf16 %v743_v60, %v743_v60 }
 0x4dc   :  { %888 = vmatmul.mubr.bf16.vlgmr.msra.gmra.mrb[8].mxu1 %v744_v63 }
 0x4dd   :  { %3855 = vmatprep.mubr.msk.bf16.mxu1 %vm4557_vm0, %v4556_v0  ;;  %3840 = vmatpush3.bf16.msra.mxu1 %v4161_v30 }
 0x4de   :  { %3841 = vmatprep.subr.bf16.mxu1 %v4556_v0 }
 0x4e1   :  { %3842 = vmatpush3.bf16.msra.mxu1 %v4162_v33 }
 0x4e2   :  { %3843 = vmatprep.subr.bf16.mxu1 %v4556_v0 }
 0x4e5   :  { %3844 = vmatpush3.bf16.msra.mxu1 %v4163_v36 }
 0x4e6   :  { %3845 = vmatprep.subr.bf16.mxu1 %v4556_v0 }
 0x5af   :  { %v889_v13 = vpop.f32.mrb[8].mxu1 }
 0x5b0   :  { %v890_v16 = vadd.f32 %v889_v13, %v768_v12  ;;  %v891_v17 = vpop.f32.mrb[9].mxu1 }
 0x5b1   :  { %v893_v18 = vpop.f32.mrb[10].mxu1  ;;  %v892_v27 = vadd.f32 %v891_v17, %v772_v25  ;;  %v4194_v17 = vld [vmem:[#allocation6 + $0xc8] sm:$0xff]   ;;  %v4200_v25 = vld [vmem:[#allocation6 + $0xf8] sm:$0xff]  }
 0x5b2   :  { %4397 = vtanh.f32 %v890_v16  ;;  %v894_v19 = vpop.f32.mrb[11].mxu1  ;;  %v4193_v16 = vld [vmem:[#allocation6 + $0xc0] sm:$0xff]   ;;  %v4195_v18 = vld [vmem:[#allocation6 + $0xd0] sm:$0xff]  }
 0x5b3   :  { %v914_v32 = vmul.f32 %v4791_v21, %v892_v27  ;;  %v4196_v19 = vld [vmem:[#allocation6 + $0xd8] sm:$0xff]  }
 0x5bc   :  { %v4398_v20 = vpop.eup %4397 }
 0x5bd   :  { %v897_v22 = vmul.f32 1.442695, %v4398_v20  ;;  %v916_v24 = vmul.f32 %v4398_v20, %v4791_v21  ;;  %v4197_v20 = vld [vmem:[#allocation6 + $0xe0] sm:$0xff]  }
 0x5bf   :  { %4399 = vpow2.f32 %v897_v22  ;;  %917 = vadd.xlane.f32.xlu0 %v916_v24  ;;  %v4198_v22 = vld [vmem:[#allocation6 + $0xe8] sm:$0xff]   ;;  %v4199_v24 = vld [vmem:[#allocation6 + $0xf0] sm:$0xff]  }
 0x5c9   :  { %v4400_v14 = vpop.eup %4399 }
 0x5ca   :  { %v905_v28 = vmul.f32 %v4400_v14, %v4791_v21  ;;  %v3393_v14 = vld [vmem:[%s5047_s7 + $0x4] sm:$0x3] }
 0x5cb   :  { %v1174_v27 = vrot.slane %v3393_v14, %v4738_v62 }
 0x5cc   :  { %v912_v29 = vadd.f32 %v4795_v26, %v905_v28 }
 0x5ce   :  { %v913_v31 = vmul.f32 %v912_v29, %v4756_v23  ;;  %v4164_v23 = vld [vmem:[#allocation7 + $0x98] sm:$0xff]  }
 0x5cf   :  { %3846 = vmatpush3.bf16.msra.mxu1 %v4164_v23  ;;  %v1178_v23 = vrot.slane %v3393_v14, %v4747_v11 }
 0x5d0   :  { %v4801_v34 = vadd.f32 %v914_v32, %v913_v31  ;;  %3847 = vmatprep.subr.bf16.mxu1 %v4556_v0 }
 0x5d2   :  { %v920_v35 = vpack.c.bf16 %v4801_v34, %v4801_v34 }
 0x5d3   :  { %3848 = vmatpush3.bf16.msra.mxu1 %v4165_v37 }
 0x5d4   :  { %3836 = vmatmul.mubr.bf16.vlgmr.msra.gmra.mrb[12].mxu0 %v920_v35  ;;  %3849 = vmatprep.subr.bf16.mxu1 %v4556_v0 }
 0x5d5   :  { %1293 = vmatprep.mubr.bf16.mxu0 %v4558_v43  ;;  %1262 = vmatpush1.bf16.msra.mxu0 %v4169_v41  ;;  %v4201_v41 = vld [vmem:[#allocation7 + $0xc0] sm:$0xff]  }
 0x5d6   :  { %1263 = vmatprep.subr.bf16.mxu0 %v4174_v44 }
 0x5d7   :  { %3850 = vmatpush3.bf16.msra.mxu1 %v4166_v38 }
 0x5d8   :  { %3851 = vmatprep.subr.bf16.mxu1 %v4556_v0 }
 0x5d9   :  { %1264 = vmatpush1.bf16.msra.mxu0 %v4172_v45  ;;  %v4202_v45 = vld [vmem:[#allocation7 + $0xc8] sm:$0xff]  }
 0x5da   :  { %1265 = vmatprep.subr.bf16.mxu0 %v4177_v46 }
 0x5db   :  { %3852 = vmatpush3.bf16.msra.mxu1 %v4167_v39 }
 0x5dc   :  { %3853 = vmatprep.subr.bf16.mxu1 %v4556_v0 }
 0x5dd   :  { %1266 = vmatpush1.bf16.msra.mxu0 %v4175_v47 }
 0x5de   :  { %1267 = vmatprep.subr.bf16.mxu0 %v4180_v48  ;;  %v4203_v48 = vld [vmem:[#allocation7 + $0xd0] sm:$0xff]  }
 0x5df   :  { %3854 = vmatpush3.bf16.msra.mxu1 %v4168_v40 }
 0x5e0   :  { %3859 = vmatprep.subr.bf16.mxu1 %v4556_v0 }
 0x5e1   :  { %1268 = vmatpush1.bf16.msra.mxu0 %v4178_v49  ;;  %v4205_v49 = vld [vmem:[#allocation7 + $0xe0] sm:$0xff]  }
 0x5e2   :  { %1269 = vmatprep.subr.bf16.mxu0 %v4183_v50  ;;  %v4206_v50 = vld [vmem:[#allocation7 + $0xe8] sm:$0xff]  }
 0x5e5   :  { %1270 = vmatpush1.bf16.msra.mxu0 %v4181_v51  ;;  %v4207_v51 = vld [vmem:[#allocation7 + $0xf0] sm:$0xff]  }
 0x5e6   :  { %1271 = vmatprep.subr.bf16.mxu0 %v4186_v52  ;;  %v4208_v52 = vld [vmem:[#allocation7 + $0xf8] sm:$0xff]  }
 0x5e9   :  { %1272 = vmatpush1.bf16.msra.mxu0 %v4184_v53  ;;  %v4209_v53 = vld [vmem:[#allocation9 + $0x180] ss:$8 sps:$4 sm:$0xff]  }
 0x5ea   :  { %1273 = vmatprep.subr.bf16.mxu0 %v4189_v54  ;;  %v4211_v54 = vld [vmem:[#allocation9 + $0x184] ss:$8 sps:$4 sm:$0xff]  }
 0x5ed   :  { %1274 = vmatpush1.bf16.msra.mxu0 %v4187_v55  ;;  %v4214_v55 = vld [vmem:[#allocation9 + $0x194] ss:$8 sps:$4 sm:$0xff]  }
 0x5ee   :  { %1275 = vmatprep.subr.bf16.mxu0 %v4192_v2  ;;  %v4224_v2 = vld [vmem:[#allocation9 + $0x1d0] ss:$8 sps:$4 sm:$0xff]  }
 0x5f1   :  { %1276 = vmatpush1.bf16.msra.mxu0 %v4190_v3  ;;  %v4229_v3 = vld [vmem:[#allocation9 + $0x1e4] ss:$8 sps:$4 sm:$0xff]  }
 0x5f2   :  { %3879 = vmatprep.subr.bf16.mxu0 %v4556_v0 }
 0x6a7   :  { %v1028_v57 = vpop.f32.mrb[12].mxu0 }
 0x6a8   :  { %v1029_v58 = vadd.f32 %v3374_v56, %v1028_v57  ;;  %v3837_v59 = vpop.f32.mrb[13].mxu0  ;;  %v4212_v56 = vld [vmem:[#allocation9 + $0x190] ss:$8 sps:$4 sm:$0xff]   ;;  %v4217_v57 = vld [vmem:[#allocation9 + $0x1a4] ss:$8 sps:$4 sm:$0xff]  }
 0x6a9   :  { %v1031_v60 = vpop.f32.mrb[14].mxu0  ;;  %v4220_v59 = vld [vmem:[#allocation9 + $0x1b4] ss:$8 sps:$4 sm:$0xff]  }
 0x6aa   :  { %v1034_v61 = vmax.f32 %v1029_v58, 0.0  ;;  %v3838_v63 = vpop.f32.mrb[15].mxu0  ;;  %v4215_v58 = vld [vmem:[#allocation9 + $0x1a0] ss:$8 sps:$4 sm:$0xff]   ;;  %v4218_v60 = vld [vmem:[#allocation9 + $0x1b0] ss:$8 sps:$4 sm:$0xff]  }
 0x6ab   :  { %v4221_v63 = vld [vmem:[#allocation9 + $0x1c0] ss:$8 sps:$4 sm:$0xff]  }
 0x6ac   :  { %v1035_v1 = vpack.c.bf16 %v1034_v61, %v1034_v61  ;;  %v4223_v61 = vld [vmem:[#allocation9 + $0x1c4] ss:$8 sps:$4 sm:$0xff]  }
 0x6ae   :  { %3856 = vmatmul.mubr.bf16.vlgmr.msra.gmra.mrb[12].mxu1 %v1035_v1  ;;  %v4226_v1 = vld [vmem:[#allocation9 + $0x1d4] ss:$8 sps:$4 sm:$0xff]  }
 0x6af   :  { %3875 = vmatprep.mubr.msk.bf16.mxu1 %vm4557_vm0, %v4556_v0  ;;  %3860 = vmatpush3.bf16.msra.mxu1 %v4193_v16 }
 0x6b0   :  { %3861 = vmatprep.subr.bf16.mxu1 %v4556_v0 }
 0x6b3   :  { %3862 = vmatpush3.bf16.msra.mxu1 %v4194_v17  ;;  %v4232_v17 = vld [vmem:[#allocation9 + $0x1f4] ss:$8 sps:$4 sm:$0xff]  }
 0x6b4   :  { %3863 = vmatprep.subr.bf16.mxu1 %v4556_v0 }
 0x6b7   :  { %3864 = vmatpush3.bf16.msra.mxu1 %v4195_v18  ;;  %v4230_v18 = vld [vmem:[#allocation9 + $0x1f0] ss:$8 sps:$4 sm:$0xff]  }
 0x6b8   :  { %3865 = vmatprep.subr.bf16.mxu1 %v4556_v0 }
 0x6bb   :  { %3866 = vmatpush3.bf16.msra.mxu1 %v4196_v19  ;;  %v3421_v19 = vld [vmem:[%s5045_s5 + $0x3] ss:$0 sm:$0xff] }
 0x6bc   :  { %3867 = vmatprep.subr.bf16.mxu1 %v4556_v0 }
 0x6bf   :  { %3868 = vmatpush3.bf16.msra.mxu1 %v4197_v20 }
 0x6c0   :  { %3869 = vmatprep.subr.bf16.mxu1 %v4556_v0 }
 0x6c3   :  { %3870 = vmatpush3.bf16.msra.mxu1 %v4198_v22 }
 0x6c4   :  { %3871 = vmatprep.subr.bf16.mxu1 %v4556_v0 }
 0x6c7   :  { %3872 = vmatpush3.bf16.msra.mxu1 %v4199_v24 }
 0x6c8   :  { %3873 = vmatprep.subr.bf16.mxu1 %v4556_v0 }
 0x6cb   :  { %3874 = vmatpush3.bf16.msra.mxu1 %v4200_v25 }
 0x6cc   :  { %1655 = vmatprep.subr.bf16.mxu1 %v4211_v54 }
 0x781   :  { %v1143_v5 = vpop.f32.mrb[12].mxu1 }
 0x782   :  { %v1144_v6 = vadd.f32 %v3384_v4, %v1143_v5  ;;  %v3857_v7 = vpop.f32.mrb[13].mxu1  ;;  %v4227_v4 = vld [vmem:[#allocation9 + $0x1e0] ss:$8 sps:$4 sm:$0xff]   ;;  %v3411_v5 = vld [vmem:[%s5043_s3 + $0x3] ss:$0 sm:$0xff] }
 0x783   :  { %v1146_v9 = vpop.f32.mrb[14].mxu1 }
 0x784   :  { %v1149_v10 = vmax.f32 %v1144_v6, 0.0  ;;  %v3858_v12 = vpop.f32.mrb[15].mxu1 }
 0x786   :  { %v1150_v13 = vpack.c.bf16 %v1149_v10, %v1149_v10 }
 0x788   :  { %1294 = vmatmul.mubr.bf16.vlgmr.msra.gmra.mrb[16].mxu0 %v1150_v13 }
 0x789   :  { %3895 = vmatprep.mubr.msk.bf16.mxu0 %vm4557_vm0, %v4556_v0  ;;  %3880 = vmatpush3.bf16.msra.mxu0 %v4201_v41 }
 0x78a   :  { %3881 = vmatprep.subr.bf16.mxu0 %v4556_v0 }
 0x78d   :  { %3882 = vmatpush3.bf16.msra.mxu0 %v4202_v45 }
 0x78e   :  { %3883 = vmatprep.subr.bf16.mxu0 %v4556_v0 }
 0x791   :  { %3884 = vmatpush3.bf16.msra.mxu0 %v4203_v48 }
 0x792   :  { %3885 = vmatprep.subr.bf16.mxu0 %v4556_v0 }
 0x85b   :  { %v1295_v28 = vpop.f32.mrb[16].mxu0 }
 0x85c   :  { %v1296_v29 = vadd.f32 %v1295_v28, %v1174_v27  ;;  %v1297_v30 = vpop.f32.mrb[17].mxu0 }
 0x85d   :  { %v1299_v31 = vpop.f32.mrb[18].mxu0  ;;  %v1298_v38 = vadd.f32 %v1297_v30, %v1178_v23  ;;  %v4234_v30 = vld [vmem:[#allocation6 + $0x108] sm:$0xff]   ;;  %v4240_v23 = vld [vmem:[#allocation6 + $0x138] sm:$0xff]  }
 0x85e   :  { %4401 = vtanh.f32 %v1296_v29  ;;  %v1300_v32 = vpop.f32.mrb[19].mxu0  ;;  %v4233_v29 = vld [vmem:[#allocation6 + $0x100] sm:$0xff]   ;;  %v4235_v31 = vld [vmem:[#allocation6 + $0x110] sm:$0xff]  }
 0x85f   :  { %v1308_v44 = vmul.f32 %v4744_v8, %v1298_v38  ;;  %v4236_v32 = vld [vmem:[#allocation6 + $0x118] sm:$0xff]  }
 0x868   :  { %v4402_v33 = vpop.eup %4401 }
 0x869   :  { %v1303_v35 = vmul.f32 1.442695, %v4402_v33  ;;  %v1310_v36 = vmul.f32 %v4402_v33, %v4744_v8  ;;  %v4237_v33 = vld [vmem:[#allocation6 + $0x120] sm:$0xff]  }
 0x86b   :  { %4403 = vpow2.f32 %v1303_v35  ;;  %1311 = vadd.xlane.f32.xlu1 %v1310_v36  ;;  %v4238_v35 = vld [vmem:[#allocation6 + $0x128] sm:$0xff]   ;;  %v4239_v36 = vld [vmem:[#allocation6 + $0x130] sm:$0xff]  }
 0x875   :  { %v4404_v37 = vpop.eup %4403 }
 0x876   :  { %v1305_v39 = vmul.f32 %v4404_v37, %v4744_v8  ;;  %v3430_v37 = vld [vmem:[%s5047_s7 + $0x6] sm:$0x3] }
 0x877   :  { %v1568_v38 = vrot.slane %v3430_v37, %v4738_v62 }
 0x878   :  { %v1306_v40 = vadd.f32 %v4750_v15, %v1305_v39 }
 0x87a   :  { %v1307_v42 = vmul.f32 %v1306_v40, %v4801_v34  ;;  %v4204_v34 = vld [vmem:[#allocation7 + $0xd8] sm:$0xff]  }
 0x87b   :  { %3886 = vmatpush3.bf16.msra.mxu0 %v4204_v34  ;;  %v1572_v34 = vrot.slane %v3430_v37, %v4747_v11 }
 0x87c   :  { %v4842_v46 = vadd.f32 %v1308_v44, %v1307_v42  ;;  %3887 = vmatprep.subr.bf16.mxu0 %v4556_v0 }
 0x87e   :  { %v1314_v47 = vpack.c.bf16 %v4842_v46, %v4842_v46 }
 0x87f   :  { %3888 = vmatpush3.bf16.msra.mxu0 %v4205_v49 }
 0x880   :  { %3876 = vmatmul.mubr.bf16.vlgmr.msra.gmra.mrb[16].mxu1 %v1314_v47  ;;  %3889 = vmatprep.subr.bf16.mxu0 %v4556_v0 }
 0x881   :  { %1687 = vmatprep.mubr.bf16.mxu1 %v4558_v43  ;;  %1656 = vmatpush1.bf16.msra.mxu1 %v4209_v53  ;;  %v4241_v53 = vld [vmem:[#allocation7 + $0x100] sm:$0xff]  }
 0x882   :  { %1657 = vmatprep.subr.bf16.mxu1 %v4214_v55 }
 0x883   :  { %3890 = vmatpush3.bf16.msra.mxu0 %v4206_v50 }
 0x884   :  { %3891 = vmatprep.subr.bf16.mxu0 %v4556_v0 }
 0x885   :  { %1658 = vmatpush1.bf16.msra.mxu1 %v4212_v56  ;;  %v4242_v56 = vld [vmem:[#allocation7 + $0x108] sm:$0xff]  }
 0x886   :  { %1659 = vmatprep.subr.bf16.mxu1 %v4217_v57 }
 0x887   :  { %3892 = vmatpush3.bf16.msra.mxu0 %v4207_v51 }
 0x888   :  { %3893 = vmatprep.subr.bf16.mxu0 %v4556_v0 }
 0x889   :  { %1660 = vmatpush1.bf16.msra.mxu1 %v4215_v58 }
 0x88a   :  { %1661 = vmatprep.subr.bf16.mxu1 %v4220_v59  ;;  %v4243_v59 = vld [vmem:[#allocation7 + $0x110] sm:$0xff]  }
 0x88b   :  { %3894 = vmatpush3.bf16.msra.mxu0 %v4208_v52 }
 0x88c   :  { %3899 = vmatprep.subr.bf16.mxu0 %v4556_v0 }
 0x88d   :  { %1662 = vmatpush1.bf16.msra.mxu1 %v4218_v60  ;;  %v4245_v60 = vld [vmem:[#allocation7 + $0x120] sm:$0xff]  }
 0x88e   :  { %1663 = vmatprep.subr.bf16.mxu1 %v4223_v61  ;;  %v4246_v61 = vld [vmem:[#allocation7 + $0x128] sm:$0xff]  }
 0x891   :  { %1664 = vmatpush1.bf16.msra.mxu1 %v4221_v63  ;;  %v4247_v63 = vld [vmem:[#allocation7 + $0x130] sm:$0xff]  }
 0x892   :  { %1665 = vmatprep.subr.bf16.mxu1 %v4226_v1  ;;  %v4248_v1 = vld [vmem:[#allocation7 + $0x138] sm:$0xff]  }
 0x895   :  { %1666 = vmatpush1.bf16.msra.mxu1 %v4224_v2  ;;  %v4249_v2 = vld [vmem:[#allocation9 + $0x200] ss:$8 sps:$4 sm:$0xff]  }
 0x896   :  { %1667 = vmatprep.subr.bf16.mxu1 %v4229_v3  ;;  %v4251_v3 = vld [vmem:[#allocation9 + $0x204] ss:$8 sps:$4 sm:$0xff]  }
 0x899   :  { %1668 = vmatpush1.bf16.msra.mxu1 %v4227_v4  ;;  %v4254_v4 = vld [vmem:[#allocation9 + $0x214] ss:$8 sps:$4 sm:$0xff]  }
 0x89a   :  { %1669 = vmatprep.subr.bf16.mxu1 %v4232_v17  ;;  %v4264_v17 = vld [vmem:[#allocation9 + $0x250] ss:$8 sps:$4 sm:$0xff]  }
 0x89d   :  { %1670 = vmatpush1.bf16.msra.mxu1 %v4230_v18  ;;  %v4269_v18 = vld [vmem:[#allocation9 + $0x264] ss:$8 sps:$4 sm:$0xff]  }
 0x89e   :  { %3919 = vmatprep.subr.bf16.mxu1 %v4556_v0 }
 0x953   :  { %v1422_v6 = vpop.f32.mrb[16].mxu1 }
 0x954   :  { %v1423_v7 = vadd.f32 %v3411_v5, %v1422_v6  ;;  %v3877_v9 = vpop.f32.mrb[17].mxu1  ;;  %v4252_v5 = vld [vmem:[#allocation9 + $0x210] ss:$8 sps:$4 sm:$0xff]   ;;  %v4257_v6 = vld [vmem:[#allocation9 + $0x224] ss:$8 sps:$4 sm:$0xff]  }
 0x955   :  { %v1425_v10 = vpop.f32.mrb[18].mxu1  ;;  %v4260_v9 = vld [vmem:[#allocation9 + $0x234] ss:$8 sps:$4 sm:$0xff]  }
 0x956   :  { %v1428_v12 = vmax.f32 %v1423_v7, 0.0  ;;  %v3878_v13 = vpop.f32.mrb[19].mxu1  ;;  %v4255_v7 = vld [vmem:[#allocation9 + $0x220] ss:$8 sps:$4 sm:$0xff]   ;;  %v4258_v10 = vld [vmem:[#allocation9 + $0x230] ss:$8 sps:$4 sm:$0xff]  }
 0x957   :  { %v4261_v13 = vld [vmem:[#allocation9 + $0x240] ss:$8 sps:$4 sm:$0xff]  }
 0x958   :  { %v1429_v16 = vpack.c.bf16 %v1428_v12, %v1428_v12  ;;  %v4263_v12 = vld [vmem:[#allocation9 + $0x244] ss:$8 sps:$4 sm:$0xff]  }
 0x95a   :  { %3896 = vmatmul.mubr.bf16.vlgmr.msra.gmra.mrb[20].mxu0 %v1429_v16  ;;  %v4266_v16 = vld [vmem:[#allocation9 + $0x254] ss:$8 sps:$4 sm:$0xff]  }
 0x95b   :  { %3915 = vmatprep.mubr.msk.bf16.mxu0 %vm4557_vm0, %v4556_v0  ;;  %3900 = vmatpush3.bf16.msra.mxu0 %v4233_v29 }
 0x95c   :  { %3901 = vmatprep.subr.bf16.mxu0 %v4556_v0 }
 0x95f   :  { %3902 = vmatpush3.bf16.msra.mxu0 %v4234_v30  ;;  %v4272_v30 = vld [vmem:[#allocation9 + $0x274] ss:$8 sps:$4 sm:$0xff]  }
 0x960   :  { %3903 = vmatprep.subr.bf16.mxu0 %v4556_v0 }
 0x963   :  { %3904 = vmatpush3.bf16.msra.mxu0 %v4235_v31  ;;  %v4270_v31 = vld [vmem:[#allocation9 + $0x270] ss:$8 sps:$4 sm:$0xff]  }
 0x964   :  { %3905 = vmatprep.subr.bf16.mxu0 %v4556_v0 }
 0x967   :  { %3906 = vmatpush3.bf16.msra.mxu0 %v4236_v32  ;;  %v3458_v32 = vld [vmem:[%s5045_s5 + $0x4] ss:$0 sm:$0xff] }
 0x968   :  { %3907 = vmatprep.subr.bf16.mxu0 %v4556_v0 }
 0x96b   :  { %3908 = vmatpush3.bf16.msra.mxu0 %v4237_v33 }
 0x96c   :  { %3909 = vmatprep.subr.bf16.mxu0 %v4556_v0 }
 0x96f   :  { %3910 = vmatpush3.bf16.msra.mxu0 %v4238_v35 }
 0x970   :  { %3911 = vmatprep.subr.bf16.mxu0 %v4556_v0 }
 0x973   :  { %3912 = vmatpush3.bf16.msra.mxu0 %v4239_v36 }
 0x974   :  { %3913 = vmatprep.subr.bf16.mxu0 %v4556_v0 }
 0x977   :  { %3914 = vmatpush3.bf16.msra.mxu0 %v4240_v23 }
 0x978   :  { %2049 = vmatprep.subr.bf16.mxu0 %v4251_v3 }
 0xa2d   :  { %v1537_v20 = vpop.f32.mrb[20].mxu0 }
 0xa2e   :  { %v1538_v22 = vadd.f32 %v3421_v19, %v1537_v20  ;;  %v3897_v24 = vpop.f32.mrb[21].mxu0  ;;  %v4267_v19 = vld [vmem:[#allocation9 + $0x260] ss:$8 sps:$4 sm:$0xff]  }
 0xa2f   :  { %v1540_v25 = vpop.f32.mrb[22].mxu0  ;;  %v3448_v20 = vld [vmem:[%s5043_s3 + $0x4] ss:$0 sm:$0xff] }
 0xa30   :  { %v1543_v14 = vmax.f32 %v1538_v22, 0.0  ;;  %v3898_v27 = vpop.f32.mrb[23].mxu0 }
 0xa32   :  { %v1544_v28 = vpack.c.bf16 %v1543_v14, %v1543_v14 }
 0xa34   :  { %1688 = vmatmul.mubr.bf16.vlgmr.msra.gmra.mrb[20].mxu1 %v1544_v28 }
 0xa35   :  { %3935 = vmatprep.mubr.msk.bf16.mxu1 %vm4557_vm0, %v4556_v0  ;;  %3920 = vmatpush3.bf16.msra.mxu1 %v4241_v53 }
 0xa36   :  { %3921 = vmatprep.subr.bf16.mxu1 %v4556_v0 }
 0xa39   :  { %3922 = vmatpush3.bf16.msra.mxu1 %v4242_v56 }
 0xa3a   :  { %3923 = vmatprep.subr.bf16.mxu1 %v4556_v0 }
 0xa3d   :  { %3924 = vmatpush3.bf16.msra.mxu1 %v4243_v59 }
 0xa3e   :  { %3925 = vmatprep.subr.bf16.mxu1 %v4556_v0 }
 0xb07   :  { %v1689_v39 = vpop.f32.mrb[20].mxu1 }
 0xb08   :  { %v1690_v40 = vadd.f32 %v1689_v39, %v1568_v38  ;;  %v1691_v41 = vpop.f32.mrb[21].mxu1 }
 0xb09   :  { %v1693_v42 = vpop.f32.mrb[22].mxu1  ;;  %v1692_v50 = vadd.f32 %v1691_v41, %v1572_v34  ;;  %v4274_v41 = vld [vmem:[#allocation6 + $0x148] sm:$0xff]   ;;  %v4280_v34 = vld [vmem:[#allocation6 + $0x178] sm:$0xff]  }
 0xb0a   :  { %4405 = vtanh.f32 %v1690_v40  ;;  %v1694_v44 = vpop.f32.mrb[23].mxu1  ;;  %v4273_v40 = vld [vmem:[#allocation6 + $0x140] sm:$0xff]   ;;  %v4275_v42 = vld [vmem:[#allocation6 + $0x150] sm:$0xff]  }
 0xb0b   :  { %v1702_v55 = vmul.f32 %v4791_v21, %v1692_v50  ;;  %v4276_v44 = vld [vmem:[#allocation6 + $0x158] sm:$0xff]  }
 0xb14   :  { %v4406_v45 = vpop.eup %4405 }
 0xb15   :  { %v1697_v47 = vmul.f32 1.442695, %v4406_v45  ;;  %v1704_v48 = vmul.f32 %v4406_v45, %v4791_v21  ;;  %v4277_v45 = vld [vmem:[#allocation6 + $0x160] sm:$0xff]  }
 0xb17   :  { %4407 = vpow2.f32 %v1697_v47  ;;  %1705 = vadd.xlane.f32.xlu1 %v1704_v48  ;;  %v4278_v47 = vld [vmem:[#allocation6 + $0x168] sm:$0xff]   ;;  %v4279_v48 = vld [vmem:[#allocation6 + $0x170] sm:$0xff]  }
 0xb21   :  { %v4408_v49 = vpop.eup %4407 }
 0xb22   :  { %v1699_v51 = vmul.f32 %v4408_v49, %v4791_v21  ;;  %v3467_v49 = vld [vmem:[%s5047_s7 + $0x8] sm:$0x3] }
 0xb23   :  { %v1962_v50 = vrot.slane %v3467_v49, %v4738_v62 }
 0xb24   :  { %v1700_v52 = vadd.f32 %v4795_v26, %v1699_v51 }
 0xb26   :  { %v1701_v54 = vmul.f32 %v1700_v52, %v4842_v46  ;;  %v4244_v46 = vld [vmem:[#allocation7 + $0x118] sm:$0xff]  }
 0xb27   :  { %3926 = vmatpush3.bf16.msra.mxu1 %v4244_v46  ;;  %v1966_v46 = vrot.slane %v3467_v49, %v4747_v11 }
 0xb28   :  { %v4883_v57 = vadd.f32 %v1702_v55, %v1701_v54  ;;  %3927 = vmatprep.subr.bf16.mxu1 %v4556_v0 }
 0xb2a   :  { %v1708_v58 = vpack.c.bf16 %v4883_v57, %v4883_v57 }
 0xb2b   :  { %3928 = vmatpush3.bf16.msra.mxu1 %v4245_v60 }
 0xb2c   :  { %3916 = vmatmul.mubr.bf16.vlgmr.msra.gmra.mrb[24].mxu0 %v1708_v58  ;;  %3929 = vmatprep.subr.bf16.mxu1 %v4556_v0 }
 0xb2d   :  { %2081 = vmatprep.mubr.bf16.mxu0 %v4558_v43  ;;  %2050 = vmatpush1.bf16.msra.mxu0 %v4249_v2  ;;  %v4281_v2 = vld [vmem:[#allocation7 + $0x140] sm:$0xff]  }
 0xb2e   :  { %2051 = vmatprep.subr.bf16.mxu0 %v4254_v4  ;;  %v4923_v4 = vld [vmem:[#allocation4] ss:$0 sm:$0xff] }
 0xb2f   :  { %3930 = vmatpush3.bf16.msra.mxu1 %v4246_v61 }
 0xb30   :  { %3931 = vmatprep.subr.bf16.mxu1 %v4556_v0 }
 0xb31   :  { %2052 = vmatpush1.bf16.msra.mxu0 %v4252_v5 }
 0xb32   :  { %2053 = vmatprep.subr.bf16.mxu0 %v4257_v6  ;;  %v4282_v6 = vld [vmem:[#allocation7 + $0x148] sm:$0xff]  }
 0xb33   :  { %3932 = vmatpush3.bf16.msra.mxu1 %v4247_v63 }
 0xb34   :  { %3933 = vmatprep.subr.bf16.mxu1 %v4556_v0 }
 0xb35   :  { %2054 = vmatpush1.bf16.msra.mxu0 %v4255_v7 }
 0xb36   :  { %2055 = vmatprep.subr.bf16.mxu0 %v4260_v9 }
 0xb37   :  { %3934 = vmatpush3.bf16.msra.mxu1 %v4248_v1 }
 0xb38   :  { %3939 = vmatprep.subr.bf16.mxu1 %v4556_v0 }
 0xb39   :  { %2056 = vmatpush1.bf16.msra.mxu0 %v4258_v10  ;;  %v4286_v10 = vld [vmem:[#allocation7 + $0x168] sm:$0xff]  }
 0xb3a   :  { %2057 = vmatprep.subr.bf16.mxu0 %v4263_v12  ;;  %v4287_v12 = vld [vmem:[#allocation7 + $0x170] sm:$0xff]  }
 0xb3d   :  { %2058 = vmatpush1.bf16.msra.mxu0 %v4261_v13  ;;  %v4288_v13 = vld [vmem:[#allocation7 + $0x178] sm:$0xff]  }
 0xb3e   :  { %2059 = vmatprep.subr.bf16.mxu0 %v4266_v16  ;;  %v4289_v16 = vld [vmem:[#allocation9 + $0x280] ss:$8 sps:$4 sm:$0xff]  }
 0xb41   :  { %2060 = vmatpush1.bf16.msra.mxu0 %v4264_v17  ;;  %v4291_v17 = vld [vmem:[#allocation9 + $0x284] ss:$8 sps:$4 sm:$0xff]  }
 0xb42   :  { %2061 = vmatprep.subr.bf16.mxu0 %v4269_v18  ;;  %v4294_v18 = vld [vmem:[#allocation9 + $0x294] ss:$8 sps:$4 sm:$0xff]  }
 0xb45   :  { %2062 = vmatpush1.bf16.msra.mxu0 %v4267_v19  ;;  %v4292_v19 = vld [vmem:[#allocation9 + $0x290] ss:$8 sps:$4 sm:$0xff]  }
 0xb46   :  { %2063 = vmatprep.subr.bf16.mxu0 %v4272_v30  ;;  %v4309_v30 = vld [vmem:[#allocation9 + $0x2e4] ss:$8 sps:$4 sm:$0xff]  }
 0xb49   :  { %2064 = vmatpush1.bf16.msra.mxu0 %v4270_v31  ;;  %v4307_v31 = vld [vmem:[#allocation9 + $0x2e0] ss:$8 sps:$4 sm:$0xff]  }
 0xb4a   :  { %3959 = vmatprep.subr.bf16.mxu0 %v4556_v0 }
 0xbff   :  { %v1816_v22 = vpop.f32.mrb[24].mxu0 }
 0xc00   :  { %v1817_v24 = vadd.f32 %v3448_v20, %v1816_v22  ;;  %v3917_v25 = vpop.f32.mrb[25].mxu0  ;;  %v4297_v20 = vld [vmem:[#allocation9 + $0x2a4] ss:$8 sps:$4 sm:$0xff]   ;;  %v4295_v22 = vld [vmem:[#allocation9 + $0x2a0] ss:$8 sps:$4 sm:$0xff]  }
 0xc01   :  { %v1819_v14 = vpop.f32.mrb[26].mxu0  ;;  %v4298_v25 = vld [vmem:[#allocation9 + $0x2b0] ss:$8 sps:$4 sm:$0xff]  }
 0xc02   :  { %v1822_v27 = vmax.f32 %v1817_v24, 0.0  ;;  %v3918_v28 = vpop.f32.mrb[27].mxu0  ;;  %v4300_v24 = vld [vmem:[#allocation9 + $0x2b4] ss:$8 sps:$4 sm:$0xff]   ;;  %v4303_v14 = vld [vmem:[#allocation9 + $0x2c4] ss:$8 sps:$4 sm:$0xff]  }
 0xc03   :  { %v4306_v28 = vld [vmem:[#allocation9 + $0x2d4] ss:$8 sps:$4 sm:$0xff]  }
 0xc04   :  { %v1823_v29 = vpack.c.bf16 %v1822_v27, %v1822_v27  ;;  %v4301_v27 = vld [vmem:[#allocation9 + $0x2c0] ss:$8 sps:$4 sm:$0xff]  }
 0xc06   :  { %3936 = vmatmul.mubr.bf16.vlgmr.msra.gmra.mrb[24].mxu1 %v1823_v29  ;;  %v4304_v29 = vld [vmem:[#allocation9 + $0x2d0] ss:$8 sps:$4 sm:$0xff]  }
 0xc07   :  { %3955 = vmatprep.mubr.msk.bf16.mxu1 %vm4557_vm0, %v4556_v0  ;;  %3940 = vmatpush3.bf16.msra.mxu1 %v4273_v40  ;;  %v4312_v40 = vld [vmem:[#allocation9 + $0x2f4] ss:$8 sps:$4 sm:$0xff]  }
 0xc08   :  { %3941 = vmatprep.subr.bf16.mxu1 %v4556_v0 }
 0xc0b   :  { %3942 = vmatpush3.bf16.msra.mxu1 %v4274_v41  ;;  %v4310_v41 = vld [vmem:[#allocation9 + $0x2f0] ss:$8 sps:$4 sm:$0xff]  }
 0xc0c   :  { %3943 = vmatprep.subr.bf16.mxu1 %v4556_v0 }
 0xc0f   :  { %3944 = vmatpush3.bf16.msra.mxu1 %v4275_v42  ;;  %v3495_v42 = vld [vmem:[%s5045_s5 + $0x5] ss:$0 sm:$0xff] }
 0xc10   :  { %3945 = vmatprep.subr.bf16.mxu1 %v4556_v0 }
 0xc13   :  { %3946 = vmatpush3.bf16.msra.mxu1 %v4276_v44 }
 0xc14   :  { %3947 = vmatprep.subr.bf16.mxu1 %v4556_v0 }
 0xc17   :  { %3948 = vmatpush3.bf16.msra.mxu1 %v4277_v45 }
 0xc18   :  { %3949 = vmatprep.subr.bf16.mxu1 %v4556_v0 }
 0xc1b   :  { %3950 = vmatpush3.bf16.msra.mxu1 %v4278_v47 }
 0xc1c   :  { %3951 = vmatprep.subr.bf16.mxu1 %v4556_v0 }
 0xc1f   :  { %3952 = vmatpush3.bf16.msra.mxu1 %v4279_v48 }
 0xc20   :  { %3953 = vmatprep.subr.bf16.mxu1 %v4556_v0 }
 0xc23   :  { %3954 = vmatpush3.bf16.msra.mxu1 %v4280_v34 }
 0xc24   :  { %2443 = vmatprep.subr.bf16.mxu1 %v4291_v17 }
 0xcd9   :  { %v1931_v33 = vpop.f32.mrb[24].mxu1 }
 0xcda   :  { %v1932_v35 = vadd.f32 %v3458_v32, %v1931_v33  ;;  %v3937_v36 = vpop.f32.mrb[25].mxu1  ;;  %v3485_v32 = vld [vmem:[%s5043_s3 + $0x5] ss:$0 sm:$0xff] }
 0xcdb   :  { %v1934_v23 = vpop.f32.mrb[26].mxu1 }
 0xcdc   :  { %v1937_v37 = vmax.f32 %v1932_v35, 0.0  ;;  %v3938_v38 = vpop.f32.mrb[27].mxu1 }
 0xcde   :  { %v1938_v39 = vpack.c.bf16 %v1937_v37, %v1937_v37 }
 0xce0   :  { %2082 = vmatmul.mubr.bf16.vlgmr.msra.gmra.mrb[28].mxu0 %v1938_v39 }
 0xce1   :  { %3975 = vmatprep.mubr.msk.bf16.mxu0 %vm4557_vm0, %v4556_v0  ;;  %3960 = vmatpush3.bf16.msra.mxu0 %v4281_v2 }
 0xce2   :  { %3961 = vmatprep.subr.bf16.mxu0 %v4556_v0 }
 0xce5   :  { %3962 = vmatpush3.bf16.msra.mxu0 %v4282_v6 }
 0xce6   :  { %3963 = vmatprep.subr.bf16.mxu0 %v4556_v0 }
 0xdb3   :  { %v2083_v51 = vpop.f32.mrb[28].mxu0 }
 0xdb4   :  { %v2084_v52 = vadd.f32 %v2083_v51, %v1962_v50  ;;  %v2085_v53 = vpop.f32.mrb[29].mxu0  ;;  %v4313_v51 = vld [vmem:[#allocation6 + $0x180] sm:$0xff]  }
 0xdb5   :  { %v2087_v54 = vpop.f32.mrb[30].mxu0  ;;  %v2086_v61 = vadd.f32 %v2085_v53, %v1966_v46  ;;  %v4315_v53 = vld [vmem:[#allocation6 + $0x190] sm:$0xff]   ;;  %v3504_v46 = vld [vmem:[%s5047_s7 + $0xa] sm:$0x3] }
 0xdb6   :  { %4409 = vtanh.f32 %v2084_v52  ;;  %v2088_v55 = vpop.f32.mrb[31].mxu0  ;;  %v4314_v52 = vld [vmem:[#allocation6 + $0x188] sm:$0xff]   ;;  %v4316_v54 = vld [vmem:[#allocation6 + $0x198] sm:$0xff]  }
 0xdb7   :  { %v2096_v5 = vmul.f32 %v4923_v4, %v2086_v61  ;;  %v4317_v55 = vld [vmem:[#allocation6 + $0x1a0] sm:$0xff]  }
 0xdc0   :  { %v4410_v56 = vpop.eup %4409 }
 0xdc1   :  { %v2091_v58 = vmul.f32 1.442695, %v4410_v56  ;;  %v2098_v59 = vmul.f32 %v4410_v56, %v4744_v8  ;;  %v4318_v56 = vld [vmem:[#allocation6 + $0x1a8] sm:$0xff]  }
 0xdc3   :  { %4411 = vpow2.f32 %v2091_v58  ;;  %2099 = vadd.xlane.f32.xlu0 %v2098_v59  ;;  %v4319_v58 = vld [vmem:[#allocation6 + $0x1b0] sm:$0xff]   ;;  %v4320_v59 = vld [vmem:[#allocation6 + $0x1b8] sm:$0xff]  }
 0xdcd   :  { %v4412_v60 = vpop.eup %4411 }
 0xdce   :  { %v2093_v63 = vmul.f32 %v4412_v60, %v4744_v8  ;;  %v4283_v8 = vld [vmem:[#allocation7 + $0x150] sm:$0xff]   ;;  %v2356_v60 = vrot.slane %v3504_v46, %v4738_v62 }
 0xdcf   :  { %3964 = vmatpush3.bf16.msra.mxu0 %v4283_v8  ;;  %v2360_v8 = vrot.slane %v3504_v46, %v4747_v11  ;;  %v4353_v46 = vld [vmem:[#allocation6 + $0x1c0] sm:$0xff]  }
 0xdd0   :  { %v2094_v1 = vadd.f32 %v4750_v15, %v2093_v63  ;;  %v4284_v15 = vld [vmem:[#allocation7 + $0x158] sm:$0xff]   ;;  %3965 = vmatprep.subr.bf16.mxu0 %v4556_v0 }
 0xdd2   :  { %v2095_v3 = vmul.f32 %v2094_v1, %v4883_v57  ;;  %v4285_v57 = vld [vmem:[#allocation7 + $0x160] sm:$0xff]  }
 0xdd3   :  { %3966 = vmatpush3.bf16.msra.mxu0 %v4284_v15 }
 0xdd4   :  { %v4926_v7 = vadd.f32 %v2096_v5, %v2095_v3  ;;  %3967 = vmatprep.subr.bf16.mxu0 %v4556_v0 }
 0xdd6   :  { %v2102_v9 = vpack.c.bf16 %v4926_v7, %v4926_v7 }
 0xdd7   :  { %3968 = vmatpush3.bf16.msra.mxu0 %v4285_v57 }
 0xdd8   :  { %3956 = vmatmul.mubr.bf16.vlgmr.msra.gmra.mrb[28].mxu1 %v2102_v9  ;;  %3969 = vmatprep.subr.bf16.mxu0 %v4556_v0 }
 0xdd9   :  { %2475 = vmatprep.mubr.bf16.mxu1 %v4558_v43  ;;  %2444 = vmatpush1.bf16.msra.mxu1 %v4289_v16 }
 0xdda   :  { %2445 = vmatprep.subr.bf16.mxu1 %v4294_v18  ;;  %v4322_v18 = vld [vmem:[#allocation7 + $0x188] sm:$0xff]  }
 0xddb   :  { %3970 = vmatpush3.bf16.msra.mxu0 %v4286_v10 }
 0xddc   :  { %3971 = vmatprep.subr.bf16.mxu0 %v4556_v0 }
 0xddd   :  { %2446 = vmatpush1.bf16.msra.mxu1 %v4292_v19 }
 0xdde   :  { %2447 = vmatprep.subr.bf16.mxu1 %v4297_v20 }
 0xddf   :  { %3972 = vmatpush3.bf16.msra.mxu0 %v4287_v12 }
 0xde0   :  { %3973 = vmatprep.subr.bf16.mxu0 %v4556_v0 }
 0xde1   :  { %2448 = vmatpush1.bf16.msra.mxu1 %v4295_v22  ;;  %v4323_v22 = vld [vmem:[#allocation7 + $0x190] sm:$0xff]  }
 0xde2   :  { %2449 = vmatprep.subr.bf16.mxu1 %v4300_v24  ;;  %v4327_v24 = vld [vmem:[#allocation7 + $0x1b0] sm:$0xff]  }
 0xde3   :  { %3974 = vmatpush3.bf16.msra.mxu0 %v4288_v13  ;;  %v4321_v13 = vld [vmem:[#allocation7 + $0x180] sm:$0xff]  }
 0xde4   :  { %3979 = vmatprep.subr.bf16.mxu0 %v4556_v0 }
 0xde5   :  { %2450 = vmatpush1.bf16.msra.mxu1 %v4298_v25  ;;  %v4328_v25 = vld [vmem:[#allocation7 + $0x1b8] sm:$0xff]  }
 0xde6   :  { %2451 = vmatprep.subr.bf16.mxu1 %v4303_v14  ;;  %v4329_v14 = vld [vmem:[#allocation9 + $0x300] ss:$8 sps:$4 sm:$0xff]  }
 0xde9   :  { %2452 = vmatpush1.bf16.msra.mxu1 %v4301_v27  ;;  %v4331_v27 = vld [vmem:[#allocation9 + $0x304] ss:$8 sps:$4 sm:$0xff]  }
 0xdea   :  { %2453 = vmatprep.subr.bf16.mxu1 %v4306_v28  ;;  %v4334_v28 = vld [vmem:[#allocation9 + $0x314] ss:$8 sps:$4 sm:$0xff]  }
 0xded   :  { %2454 = vmatpush1.bf16.msra.mxu1 %v4304_v29  ;;  %v4332_v29 = vld [vmem:[#allocation9 + $0x310] ss:$8 sps:$4 sm:$0xff]  }
 0xdee   :  { %2455 = vmatprep.subr.bf16.mxu1 %v4309_v30  ;;  %v4337_v30 = vld [vmem:[#allocation9 + $0x324] ss:$8 sps:$4 sm:$0xff]  }
 0xdf1   :  { %2456 = vmatpush1.bf16.msra.mxu1 %v4307_v31  ;;  %v4335_v31 = vld [vmem:[#allocation9 + $0x320] ss:$8 sps:$4 sm:$0xff]  }
 0xdf2   :  { %2457 = vmatprep.subr.bf16.mxu1 %v4312_v40  ;;  %v3522_v40 = vld [vmem:[%s5043_s3 + $0x6] ss:$0 sm:$0xff] }
 0xdf5   :  { %2458 = vmatpush1.bf16.msra.mxu1 %v4310_v41 }
 0xdf6   :  { %3999 = vmatprep.subr.bf16.mxu1 %v4556_v0 }
 0xeab   :  { %v2210_v33 = vpop.f32.mrb[28].mxu1 }
 0xeac   :  { %v2211_v35 = vadd.f32 %v3485_v32, %v2210_v33  ;;  %v3957_v36 = vpop.f32.mrb[29].mxu1  ;;  %v4340_v32 = vld [vmem:[#allocation9 + $0x334] ss:$8 sps:$4 sm:$0xff]   ;;  %v4338_v33 = vld [vmem:[#allocation9 + $0x330] ss:$8 sps:$4 sm:$0xff]  }
 0xead   :  { %v2213_v23 = vpop.f32.mrb[30].mxu1  ;;  %v4341_v36 = vld [vmem:[#allocation9 + $0x340] ss:$8 sps:$4 sm:$0xff]  }
 0xeae   :  { %v2216_v37 = vmax.f32 %v2211_v35, 0.0  ;;  %v3958_v38 = vpop.f32.mrb[31].mxu1  ;;  %v4343_v35 = vld [vmem:[#allocation9 + $0x344] ss:$8 sps:$4 sm:$0xff]   ;;  %v4346_v23 = vld [vmem:[#allocation9 + $0x354] ss:$8 sps:$4 sm:$0xff]  }
 0xeaf   :  { %v4349_v38 = vld [vmem:[#allocation9 + $0x364] ss:$8 sps:$4 sm:$0xff]  }
 0xeb0   :  { %v2217_v39 = vpack.c.bf16 %v2216_v37, %v2216_v37  ;;  %v4344_v37 = vld [vmem:[#allocation9 + $0x350] ss:$8 sps:$4 sm:$0xff]  }
 0xeb2   :  { %3976 = vmatmul.mubr.bf16.vlgmr.msra.gmra.mrb[32].mxu0 %v2217_v39  ;;  %v4347_v39 = vld [vmem:[#allocation9 + $0x360] ss:$8 sps:$4 sm:$0xff]  }
 0xeb3   :  { %3995 = vmatprep.mubr.msk.bf16.mxu0 %vm4557_vm0, %v4556_v0  ;;  %3980 = vmatpush3.bf16.msra.mxu0 %v4313_v51  ;;  %v3532_v51 = vld [vmem:[%s5045_s5 + $0x6] ss:$0 sm:$0xff] }
 0xeb4   :  { %3981 = vmatprep.subr.bf16.mxu0 %v4556_v0 }
 0xeb7   :  { %3982 = vmatpush3.bf16.msra.mxu0 %v4314_v52 }
 0xeb8   :  { %3983 = vmatprep.subr.bf16.mxu0 %v4556_v0 }
 0xebb   :  { %3984 = vmatpush3.bf16.msra.mxu0 %v4315_v53 }
 0xebc   :  { %3985 = vmatprep.subr.bf16.mxu0 %v4556_v0 }
 0xebf   :  { %3986 = vmatpush3.bf16.msra.mxu0 %v4316_v54 }
 0xec0   :  { %3987 = vmatprep.subr.bf16.mxu0 %v4556_v0 }
 0xec3   :  { %3988 = vmatpush3.bf16.msra.mxu0 %v4317_v55 }
 0xec4   :  { %3989 = vmatprep.subr.bf16.mxu0 %v4556_v0 }
 0xec7   :  { %3990 = vmatpush3.bf16.msra.mxu0 %v4318_v56 }
 0xec8   :  { %3991 = vmatprep.subr.bf16.mxu0 %v4556_v0 }
 0xecb   :  { %3992 = vmatpush3.bf16.msra.mxu0 %v4319_v58 }
 0xecc   :  { %3993 = vmatprep.subr.bf16.mxu0 %v4556_v0 }
 0xecf   :  { %3994 = vmatpush3.bf16.msra.mxu0 %v4320_v59 }
 0xed0   :  { %2837 = vmatprep.subr.bf16.mxu0 %v4331_v27  ;;  %v4362_v27 = vld [vmem:[#allocation7 + $0x1c8] sm:$0xff]  }
 0xf85   :  { %v2325_v44 = vpop.f32.mrb[32].mxu0 }
 0xf86   :  { %v2326_v45 = vadd.f32 %v3495_v42, %v2325_v44  ;;  %v3977_v47 = vpop.f32.mrb[33].mxu0 }
 0xf87   :  { %v2328_v48 = vpop.f32.mrb[34].mxu0 }
 0xf88   :  { %v2331_v34 = vmax.f32 %v2326_v45, 0.0  ;;  %v3978_v49 = vpop.f32.mrb[35].mxu0 }
 0xf89   :  { %v4352_v49 = vld [vmem:[#allocation9 + $0x374] ss:$8 sps:$4 sm:$0xff]  }
 0xf8a   :  { %v2332_v50 = vpack.c.bf16 %v2331_v34, %v2331_v34 }
 0xf8c   :  { %2476 = vmatmul.mubr.bf16.vlgmr.msra.gmra.mrb[32].mxu1 %v2332_v50  ;;  %v4350_v50 = vld [vmem:[#allocation9 + $0x370] ss:$8 sps:$4 sm:$0xff]  }
 0xf8d   :  { %4015 = vmatprep.mubr.msk.bf16.mxu1 %vm4557_vm0, %v4556_v0  ;;  %4000 = vmatpush3.bf16.msra.mxu1 %v4321_v13 }
 0xf8e   :  { %4001 = vmatprep.subr.bf16.mxu1 %v4556_v0 }
 0xf91   :  { %4002 = vmatpush3.bf16.msra.mxu1 %v4322_v18 }
 0xf92   :  { %4003 = vmatprep.subr.bf16.mxu1 %v4556_v0 }
 0xf95   :  { %4004 = vmatpush3.bf16.msra.mxu1 %v4323_v22 }
 0xf96   :  { %4005 = vmatprep.subr.bf16.mxu1 %v4556_v0 }
0x105f   :  { %v2477_v61 = vpop.f32.mrb[32].mxu1 }
0x1060   :  { %v2478_v63 = vadd.f32 %v2477_v61, %v2356_v60  ;;  %v2479_v1 = vpop.f32.mrb[33].mxu1  ;;  %v4354_v60 = vld [vmem:[#allocation6 + $0x1c8] sm:$0xff]   ;;  %v4355_v61 = vld [vmem:[#allocation6 + $0x1d0] sm:$0xff]  }
0x1061   :  { %v2481_v2 = vpop.f32.mrb[34].mxu1  ;;  %v2480_v57 = vadd.f32 %v2479_v1, %v2360_v8  ;;  %v4357_v1 = vld [vmem:[#allocation6 + $0x1e0] sm:$0xff]  }
0x1062   :  { %4413 = vtanh.f32 %v2478_v63  ;;  %v2482_v3 = vpop.f32.mrb[35].mxu1  ;;  %v4356_v63 = vld [vmem:[#allocation6 + $0x1d8] sm:$0xff]   ;;  %v4358_v2 = vld [vmem:[#allocation6 + $0x1e8] sm:$0xff]  }
0x1063   :  { %v2490_v17 = vmul.f32 %v4791_v21, %v2480_v57  ;;  %v4359_v3 = vld [vmem:[#allocation6 + $0x1f0] sm:$0xff]  }
0x106c   :  { %v4414_v5 = vpop.eup %4413 }
0x106d   :  { %v2485_v6 = vmul.f32 1.442695, %v4414_v5  ;;  %v2492_v9 = vmul.f32 %v4414_v5, %v4791_v21  ;;  %v4360_v5 = vld [vmem:[#allocation6 + $0x1f8] sm:$0xff]  }
0x106f   :  { %4415 = vpow2.f32 %v2485_v6  ;;  %2493 = vadd.xlane.f32.xlu1 %v2492_v9  ;;  %v3541_v6 = vld [vmem:[%s5047_s7 + $0xc] sm:$0x3] }
0x1070   :  { %v2750_v9 = vrot.slane %v3541_v6, %v4738_v62  ;;  %v2754_v18 = vrot.slane %v3541_v6, %v4747_v11 }
0x1079   :  { %v4416_v15 = vpop.eup %4415 }
0x107a   :  { %v2487_v10 = vmul.f32 %v4416_v15, %v4791_v21  ;;  %v4325_v21 = vld [vmem:[#allocation7 + $0x1a0] sm:$0xff]  }
0x107c   :  { %v2488_v12 = vadd.f32 %v4795_v26, %v2487_v10  ;;  %v4324_v26 = vld [vmem:[#allocation7 + $0x198] sm:$0xff]  }
0x107d   :  { %4006 = vmatpush3.bf16.msra.mxu1 %v4324_v26 }
0x107e   :  { %v2489_v16 = vmul.f32 %v2488_v12, %v4926_v7  ;;  %4007 = vmatprep.subr.bf16.mxu1 %v4556_v0  ;;  %v4326_v7 = vld [vmem:[#allocation7 + $0x1a8] sm:$0xff]  }
0x1080   :  { %v4967_v19 = vadd.f32 %v2490_v17, %v2489_v16 }
0x1081   :  { %4008 = vmatpush3.bf16.msra.mxu1 %v4325_v21  ;;  %v4426_v21 = vld [vmem:[#allocation2] ss:$0 sm:$0xff] }
0x1082   :  { %v2496_v20 = vpack.c.bf16 %v4967_v19, %v4967_v19  ;;  %4009 = vmatprep.subr.bf16.mxu1 %v4556_v0 }
0x1084   :  { %3996 = vmatmul.mubr.bf16.vlgmr.msra.gmra.mrb[36].mxu0 %v2496_v20 }
0x1085   :  { %2869 = vmatprep.mubr.bf16.mxu0 %v4558_v43  ;;  %4010 = vmatpush3.bf16.msra.mxu1 %v4326_v7 }
0x1086   :  { %4011 = vmatprep.subr.bf16.mxu1 %v4556_v0  ;;  %2838 = vmatpush1.bf16.msra.mxu0 %v4329_v14 }
0x1087   :  { %2839 = vmatprep.subr.bf16.mxu0 %v4334_v28 }
0x1089   :  { %4012 = vmatpush3.bf16.msra.mxu1 %v4327_v24  ;;  %v4361_v24 = vld [vmem:[#allocation7 + $0x1c0] sm:$0xff]  }
0x108a   :  { %4013 = vmatprep.subr.bf16.mxu1 %v4556_v0  ;;  %2840 = vmatpush1.bf16.msra.mxu0 %v4332_v29 }
0x108b   :  { %2841 = vmatprep.subr.bf16.mxu0 %v4337_v30  ;;  %v4363_v30 = vld [vmem:[#allocation7 + $0x1d0] sm:$0xff]  }
0x108d   :  { %4014 = vmatpush3.bf16.msra.mxu1 %v4328_v25 }
0x108e   :  { %4019 = vmatprep.subr.bf16.mxu1 %v4556_v0  ;;  %2842 = vmatpush1.bf16.msra.mxu0 %v4335_v31  ;;  %v4366_v31 = vld [vmem:[#allocation7 + $0x1e8] sm:$0xff]  }
0x108f   :  { %2843 = vmatprep.subr.bf16.mxu0 %v4340_v32  ;;  %v4367_v32 = vld [vmem:[#allocation7 + $0x1f0] sm:$0xff]  }
0x1092   :  { %2844 = vmatpush1.bf16.msra.mxu0 %v4338_v33  ;;  %v4369_v33 = vld [vmem:[#allocation9 + $0x380] ss:$8 sps:$4 sm:$0xff]  }
0x1093   :  { %2845 = vmatprep.subr.bf16.mxu0 %v4343_v35  ;;  %v4371_v35 = vld [vmem:[#allocation9 + $0x384] ss:$8 sps:$4 sm:$0xff]  }
0x1096   :  { %2846 = vmatpush1.bf16.msra.mxu0 %v4341_v36  ;;  %v4374_v36 = vld [vmem:[#allocation9 + $0x394] ss:$8 sps:$4 sm:$0xff]  }
0x1097   :  { %2847 = vmatprep.subr.bf16.mxu0 %v4346_v23  ;;  %v4372_v23 = vld [vmem:[#allocation9 + $0x390] ss:$8 sps:$4 sm:$0xff]  }
0x109a   :  { %2848 = vmatpush1.bf16.msra.mxu0 %v4344_v37  ;;  %v4377_v37 = vld [vmem:[#allocation9 + $0x3a4] ss:$8 sps:$4 sm:$0xff]  }
0x109b   :  { %2849 = vmatprep.subr.bf16.mxu0 %v4349_v38  ;;  %v4375_v38 = vld [vmem:[#allocation9 + $0x3a0] ss:$8 sps:$4 sm:$0xff]  }
0x109e   :  { %2850 = vmatpush1.bf16.msra.mxu0 %v4347_v39  ;;  %v4380_v39 = vld [vmem:[#allocation9 + $0x3b4] ss:$8 sps:$4 sm:$0xff]  }
0x109f   :  { %2851 = vmatprep.subr.bf16.mxu0 %v4352_v49 }
0x10a2   :  { %2852 = vmatpush1.bf16.msra.mxu0 %v4350_v50 }
0x10a3   :  { %4039 = vmatprep.subr.bf16.mxu0 %v4556_v0 }
0x1157   :  { %v2604_v41 = vpop.f32.mrb[36].mxu0 }
0x1158   :  { %v2605_v42 = vadd.f32 %v3522_v40, %v2604_v41  ;;  %v3997_v44 = vpop.f32.mrb[37].mxu0  ;;  %v4378_v40 = vld [vmem:[#allocation9 + $0x3b0] ss:$8 sps:$4 sm:$0xff]   ;;  %v4383_v41 = vld [vmem:[#allocation9 + $0x3c4] ss:$8 sps:$4 sm:$0xff]  }
0x1159   :  { %v2607_v45 = vpop.f32.mrb[38].mxu0  ;;  %v4384_v44 = vld [vmem:[#allocation9 + $0x3d0] ss:$8 sps:$4 sm:$0xff]  }
0x115a   :  { %v2610_v47 = vmax.f32 %v2605_v42, 0.0  ;;  %v3998_v48 = vpop.f32.mrb[39].mxu0  ;;  %v4386_v42 = vld [vmem:[#allocation9 + $0x3d4] ss:$8 sps:$4 sm:$0xff]   ;;  %v4389_v45 = vld [vmem:[#allocation9 + $0x3e4] ss:$8 sps:$4 sm:$0xff]  }
0x115b   :  { %v3559_v48 = vld [vmem:[%s5043_s3 + $0x7] ss:$0 sm:$0xff] }
0x115c   :  { %v2611_v34 = vpack.c.bf16 %v2610_v47, %v2610_v47  ;;  %v4387_v47 = vld [vmem:[#allocation9 + $0x3e0] ss:$8 sps:$4 sm:$0xff]  }
0x115e   :  { %4016 = vmatmul.mubr.bf16.vlgmr.msra.gmra.mrb[36].mxu1 %v2611_v34 }
0x115f   :  { %4035 = vmatprep.mubr.msk.bf16.mxu1 %vm4557_vm0, %v4556_v0  ;;  %4020 = vmatpush3.bf16.msra.mxu1 %v4353_v46 }
0x1160   :  { %4021 = vmatprep.subr.bf16.mxu1 %v4556_v0 }
0x1163   :  { %4022 = vmatpush3.bf16.msra.mxu1 %v4354_v60 }
0x1164   :  { %4023 = vmatprep.subr.bf16.mxu1 %v4556_v0 }
0x1167   :  { %4024 = vmatpush3.bf16.msra.mxu1 %v4355_v61 }
0x1168   :  { %4025 = vmatprep.subr.bf16.mxu1 %v4556_v0 }
0x116b   :  { %4026 = vmatpush3.bf16.msra.mxu1 %v4356_v63 }
0x116c   :  { %4027 = vmatprep.subr.bf16.mxu1 %v4556_v0 }
0x116f   :  { %4028 = vmatpush3.bf16.msra.mxu1 %v4357_v1 }
0x1170   :  { %4029 = vmatprep.subr.bf16.mxu1 %v4556_v0 }
0x1173   :  { %4030 = vmatpush3.bf16.msra.mxu1 %v4358_v2 }
0x1174   :  { %4031 = vmatprep.subr.bf16.mxu1 %v4556_v0 }
0x1177   :  { %4032 = vmatpush3.bf16.msra.mxu1 %v4359_v3  ;;  %v3578_v3 = vld [vmem:[%s5047_s7 + $0xe] sm:$0x3] }
0x1178   :  { %4033 = vmatprep.subr.bf16.mxu1 %v4556_v0 }
0x117b   :  { %4034 = vmatpush3.bf16.msra.mxu1 %v4360_v5  ;;  %v3144_v5 = vrot.slane %v3578_v3, %v4738_v62 }
0x117c   :  { %3231 = vmatprep.subr.bf16.mxu1 %v4371_v35 }
0x1231   :  { %v2719_v52 = vpop.f32.mrb[36].mxu1 }
0x1232   :  { %v2720_v53 = vadd.f32 %v3532_v51, %v2719_v52  ;;  %v4017_v54 = vpop.f32.mrb[37].mxu1 }
0x1233   :  { %v2722_v55 = vpop.f32.mrb[38].mxu1 }
0x1234   :  { %v2725_v56 = vmax.f32 %v2720_v53, 0.0  ;;  %v4018_v58 = vpop.f32.mrb[39].mxu1  ;;  %v4392_v55 = vld [vmem:[#allocation9 + $0x3f4] ss:$8 sps:$4 sm:$0xff]  }
0x1235   :  { %v3569_v58 = vld [vmem:[%s5045_s5 + $0x7] ss:$0 sm:$0xff] }
0x1236   :  { %v2726_v59 = vpack.c.bf16 %v2725_v56, %v2725_v56  ;;  %v4390_v56 = vld [vmem:[#allocation9 + $0x3f0] ss:$8 sps:$4 sm:$0xff]  }
0x1238   :  { %2870 = vmatmul.mubr.bf16.vlgmr.msra.gmra.mrb[40].mxu0 %v2726_v59 }
0x1239   :  { %4055 = vmatprep.mubr.msk.bf16.mxu0 %vm4557_vm0, %v4556_v0  ;;  %4040 = vmatpush3.bf16.msra.mxu0 %v4361_v24 }
0x123a   :  { %4041 = vmatprep.subr.bf16.mxu0 %v4556_v0 }
0x123d   :  { %4042 = vmatpush3.bf16.msra.mxu0 %v4362_v27 }
0x123e   :  { %4043 = vmatprep.subr.bf16.mxu0 %v4556_v0 }
0x1241   :  { %4044 = vmatpush3.bf16.msra.mxu0 %v4363_v30 }
0x1242   :  { %4045 = vmatprep.subr.bf16.mxu0 %v4556_v0 }
0x130b   :  { %v2871_v8 = vpop.f32.mrb[40].mxu0 }
0x130c   :  { %v2872_v15 = vadd.f32 %v2871_v8, %v2750_v9  ;;  %v2873_v57 = vpop.f32.mrb[41].mxu0 }
0x130d   :  { %v2875_v10 = vpop.f32.mrb[42].mxu0  ;;  %v2874_v22 = vadd.f32 %v2873_v57, %v2754_v18 }
0x130e   :  { %4417 = vtanh.f32 %v2872_v15  ;;  %v2876_v12 = vpop.f32.mrb[43].mxu0 }
0x130f   :  { %v2884_v14 = vmul.f32 %v4923_v4, %v2874_v22 }
0x1318   :  { %v4418_v13 = vpop.eup %4417 }
0x1319   :  { %v2879_v16 = vmul.f32 1.442695, %v4418_v13  ;;  %v2886_v17 = vmul.f32 %v4923_v4, %v4418_v13  ;;  %v4427_v13 = vld [vmem:[#allocation4 + $0x1] ss:$0 sm:$0xff] }
0x131b   :  { %4419 = vpow2.f32 %v2879_v16  ;;  %2887 = vadd.xlane.f32.xlu0 %v2886_v17  ;;  %v3148_v17 = vrot.slane %v3578_v3, %v4747_v11  ;;  %v1312_v11 = vpop.xlane.xlu1 %1311 }
0x1325   :  { %v4420_v20 = vpop.eup %4419 }
0x1326   :  { %v2881_v26 = vmul.f32 %v4923_v4, %v4420_v20  ;;  %v4365_v4 = vld [vmem:[#allocation7 + $0x1e0] sm:$0xff]  }
0x1328   :  { %v2882_v7 = vadd.f32 %v4426_v21, %v2881_v26  ;;  %v4428_v26 = vld [vmem:[#allocation2 + $0x1] ss:$0 sm:$0xff] }
0x132a   :  { %v2883_v25 = vmul.f32 %v2882_v7, %v4967_v19  ;;  %v4364_v19 = vld [vmem:[#allocation7 + $0x1d8] sm:$0xff]  }
0x132b   :  { %4046 = vmatpush3.bf16.msra.mxu0 %v4364_v19  ;;  %v1706_v19 = vpop.xlane.xlu1 %1705 }
0x132c   :  { %v5007_v28 = vadd.f32 %v2884_v14, %v2883_v25  ;;  %4047 = vmatprep.subr.bf16.mxu0 %v4556_v0  ;;  %v512_v25 = vpop.xlane.xlu0 %511  ;;  %v107_v14 = vld [vmem:[%s5049_s9] sm:$0xff] }
0x132e   :  { %v2890_v29 = vpack.c.bf16 %v5007_v28, %v5007_v28 }
0x132f   :  { %4048 = vmatpush3.bf16.msra.mxu0 %v4365_v4 }
0x1330   :  { %4036 = vmatmul.mubr.bf16.vlgmr.msra.gmra.mrb[40].mxu1 %v2890_v29  ;;  %4049 = vmatprep.subr.bf16.mxu0 %v4556_v0  ;;  %v918_v27 = vpop.xlane.xlu0 %917  ;;  %v513_v29 = vadd.f32 %v512_v25, %v107_v14 }
0x1331   :  { %3263 = vmatprep.mubr.bf16.mxu1 %v4558_v43  ;;  %v4368_v43 = vld [vmem:[#allocation7 + $0x1f8] sm:$0xff]   ;;  %3232 = vmatpush1.bf16.msra.mxu1 %v4369_v33 }
0x1332   :  { %3233 = vmatprep.subr.bf16.mxu1 %v4374_v36  ;;  %v919_v30 = vadd.f32 %v918_v27, %v513_v29 }
0x1333   :  { %4050 = vmatpush3.bf16.msra.mxu0 %v4366_v31 }
0x1334   :  { %4051 = vmatprep.subr.bf16.mxu0 %v4556_v0  ;;  %v1313_v4 = vadd.f32 %v1312_v11, %v919_v30  ;;  %v2100_v31 = vpop.xlane.xlu0 %2099 }
0x1335   :  { %3234 = vmatpush1.bf16.msra.mxu1 %v4372_v23 }
0x1336   :  { %3235 = vmatprep.subr.bf16.mxu1 %v4377_v37 }
0x1337   :  { %4052 = vmatpush3.bf16.msra.mxu0 %v4367_v32  ;;  %v1707_v32 = vadd.f32 %v1706_v19, %v1313_v4 }
0x1338   :  { %4053 = vmatprep.subr.bf16.mxu0 %v4556_v0  ;;  %v4381_v0 = vld [vmem:[#allocation9 + $0x3c0] ss:$8 sps:$4 sm:$0xff]  }
0x1339   :  { %3236 = vmatpush1.bf16.msra.mxu1 %v4375_v38 }
0x133a   :  { %3237 = vmatprep.subr.bf16.mxu1 %v4380_v39 }
0x133b   :  { %4054 = vmatpush3.bf16.msra.mxu0 %v4368_v43  ;;  %v2101_v43 = vadd.f32 %v2100_v31, %v1707_v32 }
0x133d   :  { %3238 = vmatpush1.bf16.msra.mxu1 %v4378_v40 }
0x133e   :  { %3239 = vmatprep.subr.bf16.mxu1 %v4383_v41 }
0x1341   :  { %3240 = vmatpush1.bf16.msra.mxu1 %v4381_v0 }
0x1342   :  { %3241 = vmatprep.subr.bf16.mxu1 %v4386_v42 }
0x1345   :  { %3242 = vmatpush1.bf16.msra.mxu1 %v4384_v44 }
0x1346   :  { %3243 = vmatprep.subr.bf16.mxu1 %v4389_v45 }
0x1349   :  { %3244 = vmatpush1.bf16.msra.mxu1 %v4387_v47 }
0x134a   :  { %3245 = vmatprep.subr.bf16.mxu1 %v4392_v55 }
0x134d   :  { %3246 = vmatpush1.bf16.msra.mxu1 %v4390_v56 }
0x13a8   :  { %v2888_v33 = vpop.xlane.xlu0 %2887 }
0x1403   :  { %v2998_v34 = vpop.f32.mrb[40].mxu1 }
0x1404   :  { %v2999_v49 = vadd.f32 %v3559_v48, %v2998_v34  ;;  %v4037_v50 = vpop.f32.mrb[41].mxu1 }
0x1405   :  { %v3001_v51 = vpop.f32.mrb[42].mxu1 }
0x1406   :  { %v3004_v52 = vmax.f32 %v2999_v49, 0.0  ;;  %v4038_v53 = vpop.f32.mrb[43].mxu1 }
0x1408   :  { %v3005_v54 = vpack.c.bf16 %v3004_v52, %v3004_v52 }
0x140a   :  { %4056 = vmatmul.mubr.bf16.vlgmr.msra.gmra.mrb[44].mxu0 %v3005_v54 }
0x14dd   :  { %v3113_v59 = vpop.f32.mrb[44].mxu0 }
0x14de   :  { %v3114_v46 = vadd.f32 %v3569_v58, %v3113_v59  ;;  %v4057_v60 = vpop.f32.mrb[45].mxu0 }
0x14df   :  { %v3116_v61 = vpop.f32.mrb[46].mxu0 }
0x14e0   :  { %v3119_v63 = vmax.f32 %v3114_v46, 0.0  ;;  %v4058_v1 = vpop.f32.mrb[47].mxu0 }
0x14e2   :  { %v3120_v2 = vpack.c.bf16 %v3119_v63, %v3119_v63 }
0x14e4   :  { %3264 = vmatmul.mubr.bf16.vlgmr.msra.gmra.mrb[44].mxu1 %v3120_v2 }
0x15b7   :  { %v3265_v6 = vpop.f32.mrb[44].mxu1 }
0x15b8   :  { %v3266_v9 = vadd.f32 %v3265_v6, %v3144_v5  ;;  %v3267_v8 = vpop.f32.mrb[45].mxu1 }
0x15b9   :  { %v3269_v15 = vpop.f32.mrb[46].mxu1  ;;  %v3268_v20 = vadd.f32 %v3267_v8, %v3148_v17 }
0x15ba   :  { %4421 = vtanh.f32 %v3266_v9  ;;  %v3270_v57 = vpop.f32.mrb[47].mxu1 }
0x15bb   :  { %v3278_v7 = vmul.f32 %v4427_v13, %v3268_v20 }
0x15c4   :  { %v4422_v10 = vpop.eup %4421 }
0x15c5   :  { %v3273_v12 = vmul.f32 1.442695, %v4422_v10  ;;  %v3280_v16 = vmul.f32 %v4427_v13, %v4422_v10 }
0x15c7   :  { %4423 = vpow2.f32 %v3273_v12  ;;  %3281 = vadd.xlane.f32.xlu1 %v3280_v16 }
0x15d1   :  { %v4424_v18 = vpop.eup %4423 }
0x15d2   :  { %v3275_v22 = vmul.f32 %v4427_v13, %v4424_v18 }
0x15d4   :  { %v3276_v21 = vadd.f32 %v4428_v26, %v3275_v22 }
0x15d6   :  { %v3277_v62 = vmul.f32 %v3276_v21, %v5007_v28  ;;  %v2494_v28 = vpop.xlane.xlu1 %2493 }
0x15d7   :  { %v2495_v35 = vadd.f32 %v2494_v28, %v2101_v43 }
0x15d8   :  { %v3279_v24 = vadd.f32 %v3278_v7, %v3277_v62 }
0x15d9   :  { %v2889_v36 = vadd.f32 %v2888_v33, %v2495_v35 }
0x15da   :  { %3284 = vst [vmem:[%s5050_s10] sm:$0xff] %v3279_v24 }
0x1654   :  { %v3282_v23 = vpop.xlane.xlu1 %3281 }
0x1655   :  { %v3283_v37 = vadd.f32 %v3282_v23, %v2889_v36 }
0x1657   :  { %3286 = vst.msk [vmem:[%s5051_s11] sm:$0xff] %vm3285_vm1, %v3283_v37 }
0x1658   :  { %3295 = vsyncpa [#allocation3], 1 }
0x1659   :  { %3296 = vsyncpa [#allocation5], 1 }
0x165a   :  { %3297 = vsyncpa [#allocation8], 1 }

</bundles_post_ra>
